<compile_context>
chip_gen: v7x
topology: tpu7x:2x2x1
jax: 0.10.0
libtpu: 0.0.40
codegen_flags: <defaults>
</compile_context>

<pallas_src>
import functools

import jax
import jax.numpy as jnp
from jax import lax
from jax.experimental import pallas as pl
from jax.experimental.pallas import tpu as pltpu

# ------------------------------- config --------------------------------
B = 2            # batch
S_LEN = 8        # source length
T_LEN = 9        # target length (tgt[:-1] -> 8 decoding steps)
EMB = 32         # word-embedding dim
HID = 32         # RNN hidden dim
FEAT_EMB = 8     # per-WALS-feature embedding dim
WALS_DIM = 16    # MLP_target_or_both output dim
VOCAB = 20
N_FEAT_VALS = 5

SimulationLanguages = ["lang_src", "lang_tgt"]
FeatureTypes = [("Phonology", ["F1", "F2"]), ("Morphology", ["F3", "F4"])]
ALL_FEATURES = [f for _, fl in FeatureTypes for f in fl]
WALS_CONCAT_DIM = len(ALL_FEATURES) * FEAT_EMB          # 4 * 8 = 32
WALS_MODEL = "WalstoDecHidden_Target"                   # target-language variant

FeatureValues = {
    "lang_src": {"F1": 0, "F2": 1, "F3": 2, "F4": 3},
    "lang_tgt": {"F1": 4, "F2": 3, "F3": 1, "F4": 0},
}


def flip_simulation_languages(sim_langs, flip):
    # NOTE: mirrors the reference, which flips *after* the WALS features have
    # been computed, so flipping only affects subsequent calls.
    if flip:
        sim_langs[0], sim_langs[1] = sim_langs[1], sim_langs[0]
    return sim_langs


# ------------------------------ WALS feature path ------------------------------
def get_local_features_jax(params):
    # Mirrors get_local_features for wals_model == 'WalstoDecHidden_Target'.
    # Tiny embedding gathers + concat + (1,32)@(32,16)+ReLU: plain JAX (XLA
    # fuses it); a dedicated pallas_call here would be pure launch overhead.
    out = {}
    for lang in SimulationLanguages:
        l_all = []
        for _ftype_name, feats in FeatureTypes:
            l_pertype = []
            for feat in feats:
                idx = FeatureValues[lang][feat]
                row = params["EmbeddingFeatures"][feat][idx]       # (FEAT_EMB,)
                l_pertype.append(row.reshape(1, FEAT_EMB))         # .view(1, len)
            l_all.append(jnp.concatenate(l_pertype, axis=1))
        out[lang] = jnp.concatenate(l_all, axis=1)                 # (1, WALS_CONCAT_DIM)
    wals = out[SimulationLanguages[1]]                             # *_Target variant
    return jax.nn.relu(wals @ params["mlp_w"] + params["mlp_b"])   # (1, WALS_DIM)


# --------------------------- fused forward kernel ---------------------------
def _make_fused_kernel(seq_s, seq_t, batch, use_dec_state):
    """Build the fused encoder-RNN + decoder-RNN + attention kernel.

    seq_s / seq_t / batch are static Python ints (loops are fully unrolled);
    use_dec_state selects (at trace time) whether the decoder starts from the
    provided dec_state or from the encoder's final hidden state.
    """

    def kernel(src_ref, tgt_ref, h0dec_ref,
               enc_wih_ref, enc_whh_ref, enc_b_ref,
               dec_wih_ref, dec_whh_ref, dec_b_ref,
               wa_ref, wc_ctx_ref, wc_dec_ref, ba_ref, bc_ref,
               out_ref, attn_ref, dech_ref,
               ctx_scr, rnn_scr):
        f32 = jnp.float32
        hid = enc_whh_ref.shape[0]

        # ---- hoisted, time-parallel input projections (one MXU matmul each) ----
        pre_enc = (jnp.dot(src_ref[...], enc_wih_ref[...],
                           preferred_element_type=f32) + enc_b_ref[...])   # (S*B, H)
        pre_dec = (jnp.dot(tgt_ref[...], dec_wih_ref[...],
                           preferred_element_type=f32) + dec_b_ref[...])   # (T*B, H)

        enc_whh = enc_whh_ref[...]
        dec_whh = dec_whh_ref[...]

        # ---- encoder tanh-RNN recurrence (serial over S, fully unrolled) ----
        h = jnp.zeros((batch, hid), f32)
        for t in range(seq_s):
            h = jnp.tanh(pre_enc[t * batch:(t + 1) * batch, :]
                         + jnp.dot(h, enc_whh, preferred_element_type=f32))
            # Stage encoder outputs batch-major (row = b*S + t) so the
            # attention below reads contiguous (S, H) blocks per batch.
            for b in range(batch):
                r = b * seq_s + t
                ctx_scr[r:r + 1, :] = h[b:b + 1, :]

        # ---- decoder tanh-RNN recurrence (init: enc final hidden / dec_state) ----
        if use_dec_state:
            h = h0dec_ref[...]
        for t in range(seq_t):
            h = jnp.tanh(pre_dec[t * batch:(t + 1) * batch, :]
                         + jnp.dot(h, dec_whh, preferred_element_type=f32))
            for b in range(batch):
                r = b * seq_t + t
                rnn_scr[r:r + 1, :] = h[b:b + 1, :]
        dech_ref[...] = h                                          # (B, H)

        # ---- global attention ("general") + output proj, all T steps at once ----
        # WalstoDecHidden: dec_cat = [rnn_out ; wals].  The wals part of
        # dec_cat @ W_a and of [c ; dec_cat] @ W_c is folded into the constant
        # biases ba / bc (precomputed in the wrapper), so no concatenation.
        rnn_all = rnn_scr[...]                                     # (B*T, H) batch-major
        q_all = (jnp.dot(rnn_all, wa_ref[...], preferred_element_type=f32)
                 + ba_ref[...])                                    # (B*T, H)
        wc_ctx = wc_ctx_ref[...]
        wc_dec = wc_dec_ref[...]
        bc = bc_ref[...]

        for b in range(batch):
            ctx_b = ctx_scr[b * seq_s:(b + 1) * seq_s, :]          # (S, H)
            q_b = q_all[b * seq_t:(b + 1) * seq_t, :]              # (T, H)
            dec_b = rnn_all[b * seq_t:(b + 1) * seq_t, :]          # (T, H)

            # scores[t, s] = q_b[t, :] . ctx_b[s, :]   (MXU, rhs-transposed form)
            scores = lax.dot_general(q_b, ctx_b, (((1,), (1,)), ((), ())),
                                     preferred_element_type=f32)   # (T, S)
            m = jnp.max(scores, axis=-1, keepdims=True)
            e = jnp.exp(scores - m)
            alpha = e / jnp.sum(e, axis=-1, keepdims=True)         # softmax over S
            c = jnp.dot(alpha, ctx_b, preferred_element_type=f32)  # (T, H)

            out_b = jnp.tanh(jnp.dot(c, wc_ctx, preferred_element_type=f32)
                             + jnp.dot(dec_b, wc_dec, preferred_element_type=f32)
                             + bc)                                  # (T, H)

            out_ref[b * seq_t:(b + 1) * seq_t, :] = out_b
            attn_ref[b * seq_t:(b + 1) * seq_t, :] = alpha

    return kernel


def _fused_call(src_emb, tgt_emb, h0_dec,
                enc_w_ih, enc_w_hh, enc_b,
                dec_w_ih, dec_w_hh, dec_b,
                w_a_h, w_c_ctx, w_c_dec, bias_a, bias_c,
                *, seq_s, seq_t, batch, use_dec_state):
    hid = enc_w_hh.shape[0]
    kernel = _make_fused_kernel(seq_s, seq_t, batch, use_dec_state)
    # Single kernel invocation (no grid): the whole working set is < 1 MiB, so
    # everything lives in VMEM for the duration of the call.
    # NOTE(v7x): with no grid there is nothing to shard across the 2 TCs; if
    # batch grows, add a leading 'parallel' batch grid axis.
    return pl.pallas_call(
        kernel,
        out_shape=(jax.ShapeDtypeStruct((batch * seq_t, hid), jnp.float32),   # out
                   jax.ShapeDtypeStruct((batch * seq_t, seq_s), jnp.float32), # attn
                   jax.ShapeDtypeStruct((batch, hid), jnp.float32)),          # dec_hidden
        scratch_shapes=[pltpu.VMEM((batch * seq_s, hid), jnp.float32),        # encoder ctx
                        pltpu.VMEM((batch * seq_t, hid), jnp.float32)],       # decoder rnn_out
    )(src_emb, tgt_emb, h0_dec,
      enc_w_ih, enc_w_hh, enc_b,
      dec_w_ih, dec_w_hh, dec_b,
      w_a_h, w_c_ctx, w_c_dec, bias_a, bias_c)


# --------------------------------- forward ---------------------------------
def walsto_dec_hidden_forward(params, src, tgt, lengths, dec_state=None, flipping=False):
    # ---- WALS feature path (plain JAX) ----
    wals = get_local_features_jax(params)                          # (1, WALS_DIM)
    flip_simulation_languages(SimulationLanguages, flipping)
    # Reference reshapes wals to (1, 1, WALS_DIM) and concatenates it to every
    # decoder hidden state; here it is algebraically folded into the attention
    # biases below (identical math, no concatenation / broadcast).

    tgt = tgt[:-1]                                                 # (T, B)
    seq_s, batch = src.shape
    seq_t = tgt.shape[0]
    hid = params["enc_w_hh"].shape[0]

    # ---- fold the WALS vector into constant attention biases ----
    w_a = params["attn_w_a"]               # (HID+WALS_DIM, HID)
    w_c = params["attn_w_c"]               # (2*HID+WALS_DIM, HID)
    w_a_h = w_a[:hid, :]
    bias_a = wals @ w_a[hid:, :]                                   # (1, HID)
    w_c_ctx = w_c[:hid, :]
    w_c_dec = w_c[hid:2 * hid, :]
    bias_c = wals @ w_c[2 * hid:, :] + params["attn_b_c"]          # (1, HID)

    # ---- embedding gathers (plain JAX), flattened time-major (row = t*B + b) ----
    src_emb = params["src_embed"][src].reshape(seq_s * batch, EMB)
    tgt_emb = params["tgt_embed"][tgt].reshape(seq_t * batch, EMB)
    # TODO(synk): source `lengths` masking (pack_padded_sequence + attention
    # length mask) is not applied; sequences are assumed full-length.

    use_dec_state = dec_state is not None
    h0_dec = dec_state if use_dec_state else jnp.zeros((batch, hid), jnp.float32)

    out_flat, attn_flat, dec_hidden = _fused_call(
        src_emb, tgt_emb, h0_dec,
        params["enc_w_ih"], params["enc_w_hh"], params["enc_b"],
        params["dec_w_ih"], params["dec_w_hh"], params["dec_b"],
        w_a_h, w_c_ctx, w_c_dec, bias_a, bias_c,
        seq_s=seq_s, seq_t=seq_t, batch=batch, use_dec_state=use_dec_state)

    # Kernel writes dense batch-major slabs; restore time-major layout in XLA.
    out = out_flat.reshape(batch, seq_t, hid).transpose(1, 0, 2)        # (T, B, HID)
    attn = attn_flat.reshape(batch, seq_t, seq_s).transpose(1, 0, 2)    # (T, B, S)
    attns = {"std": attn}
    return out, attns, dec_hidden


# ------------------------------ parameter init ------------------------------
def init_params(key):
    keys = jax.random.split(key, 16)

    def nrm(k, shape, scale=0.1):
        return (scale * jax.random.normal(k, shape)).astype(jnp.float32)

    p = {}
    p["EmbeddingFeatures"] = {
        feat: nrm(jax.random.fold_in(keys[0], i), (N_FEAT_VALS, FEAT_EMB))
        for i, feat in enumerate(ALL_FEATURES)
    }
    p["mlp_w"] = nrm(keys[1], (WALS_CONCAT_DIM, WALS_DIM))
    p["mlp_b"] = nrm(keys[2], (1, WALS_DIM))
    p["src_embed"] = nrm(keys[3], (VOCAB, EMB))
    p["tgt_embed"] = nrm(keys[4], (VOCAB, EMB))
    p["enc_w_ih"] = nrm(keys[5], (EMB, HID))
    p["enc_w_hh"] = nrm(keys[6], (HID, HID))
    p["enc_b"] = nrm(keys[7], (1, HID))
    p["dec_w_ih"] = nrm(keys[8], (EMB, HID))
    p["dec_w_hh"] = nrm(keys[9], (HID, HID))
    p["dec_b"] = nrm(keys[10], (1, HID))
    D = HID + WALS_DIM
    p["attn_w_a"] = nrm(keys[11], (D, HID))
    p["attn_w_c"] = nrm(keys[12], (HID + D, HID))
    p["attn_b_c"] = nrm(keys[13], (1, HID))
    return p


if __name__ == "__main__":
    key = jax.random.PRNGKey(0)
    pkey, skey, tkey = jax.random.split(key, 3)
    params = init_params(pkey)

    src = jax.random.randint(skey, (S_LEN, B), 0, VOCAB, dtype=jnp.int32)
    tgt = jax.random.randint(tkey, (T_LEN, B), 0, VOCAB, dtype=jnp.int32)
    lengths = jnp.full((B,), S_LEN, dtype=jnp.int32)

    out, attns, dec_state = walsto_dec_hidden_forward(
        params, src, tgt, lengths, dec_state=None, flipping=False)

    jax.block_until_ready(out)
    jax.block_until_ready(attns["std"])
    jax.block_until_ready(dec_state)

    assert out.shape == (T_LEN - 1, B, HID)
    assert attns["std"].shape == (T_LEN - 1, B, S_LEN)
    assert dec_state.shape == (B, HID)
    assert bool(jnp.all(jnp.isfinite(out)))
    assert bool(jnp.all(jnp.isfinite(attns["std"])))
    # attention rows must sum to 1 (softmax over source positions)
    assert bool(jnp.all(jnp.abs(jnp.sum(attns["std"], axis=-1) - 1.0) < 1e-4))
    print("KERNEL_OK")
</pallas_src>

<mosaic_0001>
module attributes {stable_mosaic.version = 11 : i64} {
  func.func @kernel(%arg0: memref<16x32xf32, #tpu.memory_space<vmem>>, %arg1: memref<16x32xf32, #tpu.memory_space<vmem>>, %arg2: memref<2x32xf32, #tpu.memory_space<vmem>>, %arg3: memref<32x32xf32, #tpu.memory_space<vmem>>, %arg4: memref<32x32xf32, #tpu.memory_space<vmem>>, %arg5: memref<1x32xf32, #tpu.memory_space<vmem>>, %arg6: memref<32x32xf32, #tpu.memory_space<vmem>>, %arg7: memref<32x32xf32, #tpu.memory_space<vmem>>, %arg8: memref<1x32xf32, #tpu.memory_space<vmem>>, %arg9: memref<32x32xf32, #tpu.memory_space<vmem>>, %arg10: memref<32x32xf32, #tpu.memory_space<vmem>>, %arg11: memref<32x32xf32, #tpu.memory_space<vmem>>, %arg12: memref<1x32xf32, #tpu.memory_space<vmem>>, %arg13: memref<1x32xf32, #tpu.memory_space<vmem>>, %arg14: memref<16x32xf32, #tpu.memory_space<vmem>>, %arg15: memref<16x8xf32, #tpu.memory_space<vmem>>, %arg16: memref<2x32xf32, #tpu.memory_space<vmem>>, %arg17: memref<16x32xf32, #tpu.memory_space<vmem>>, %arg18: memref<16x32xf32, #tpu.memory_space<vmem>>) attributes {dimension_semantics = [], scalar_prefetch = 0 : i64, scratch_operands = 2 : i64, tpu.core_type = #tpu.core_type<tc>} {
    %c0 = arith.constant 0 : index
    %c0_0 = arith.constant 0 : index
    %0 = vector.load %arg0[%c0, %c0_0] : memref<16x32xf32, #tpu.memory_space<vmem>>, vector<16x32xf32>
    %c0_1 = arith.constant 0 : index
    %c0_2 = arith.constant 0 : index
    %1 = vector.load %arg3[%c0_1, %c0_2] : memref<32x32xf32, #tpu.memory_space<vmem>>, vector<32x32xf32>
    %cst = arith.constant dense<0.000000e+00> : vector<16x32xf32>
    %2 = tpu.matmul %0, %1, %cst {dimension_numbers = #tpu.dot_dimension_numbers<[1], [0], [0], [1], [0, 0, 1, 1], [], []>} : vector<16x32xf32>, vector<32x32xf32>, vector<16x32xf32> -> vector<16x32xf32>
    %c0_3 = arith.constant 0 : index
    %c0_4 = arith.constant 0 : index
    %3 = vector.load %arg5[%c0_3, %c0_4] : memref<1x32xf32, #tpu.memory_space<vmem>>, vector<1x32xf32>
    %4 = vector.broadcast %3 : vector<1x32xf32> to vector<16x32xf32>
    %5 = arith.addf %2, %4 : vector<16x32xf32>
    %c0_5 = arith.constant 0 : index
    %c0_6 = arith.constant 0 : index
    %6 = vector.load %arg1[%c0_5, %c0_6] : memref<16x32xf32, #tpu.memory_space<vmem>>, vector<16x32xf32>
    %c0_7 = arith.constant 0 : index
    %c0_8 = arith.constant 0 : index
    %7 = vector.load %arg6[%c0_7, %c0_8] : memref<32x32xf32, #tpu.memory_space<vmem>>, vector<32x32xf32>
    %cst_9 = arith.constant dense<0.000000e+00> : vector<16x32xf32>
    %8 = tpu.matmul %6, %7, %cst_9 {dimension_numbers = #tpu.dot_dimension_numbers<[1], [0], [0], [1], [0, 0, 1, 1], [], []>} : vector<16x32xf32>, vector<32x32xf32>, vector<16x32xf32> -> vector<16x32xf32>
    %c0_10 = arith.constant 0 : index
    %c0_11 = arith.constant 0 : index
    %9 = vector.load %arg8[%c0_10, %c0_11] : memref<1x32xf32, #tpu.memory_space<vmem>>, vector<1x32xf32>
    %10 = vector.broadcast %9 : vector<1x32xf32> to vector<16x32xf32>
    %11 = arith.addf %8, %10 : vector<16x32xf32>
    %c0_12 = arith.constant 0 : index
    %c0_13 = arith.constant 0 : index
    %12 = vector.load %arg4[%c0_12, %c0_13] : memref<32x32xf32, #tpu.memory_space<vmem>>, vector<32x32xf32>
    %c0_14 = arith.constant 0 : index
    %c0_15 = arith.constant 0 : index
    %13 = vector.load %arg7[%c0_14, %c0_15] : memref<32x32xf32, #tpu.memory_space<vmem>>, vector<32x32xf32>
    %cst_16 = arith.constant 0.000000e+00 : f32
    %14 = vector.broadcast %cst_16 : f32 to vector<2x32xf32>
    %15 = vector.extract_strided_slice %5 {offsets = [0, 0], sizes = [2, 32], strides = [1, 1]} : vector<16x32xf32> to vector<2x32xf32>
    %cst_17 = arith.constant dense<0.000000e+00> : vector<2x32xf32>
    %16 = tpu.matmul %14, %12, %cst_17 {dimension_numbers = #tpu.dot_dimension_numbers<[1], [0], [0], [1], [0, 0, 1, 1], [], []>} : vector<2x32xf32>, vector<32x32xf32>, vector<2x32xf32> -> vector<2x32xf32>
    %17 = arith.addf %15, %16 : vector<2x32xf32>
    %18 = math.tanh %17 : vector<2x32xf32>
    %19 = vector.extract_strided_slice %18 {offsets = [0, 0], sizes = [1, 32], strides = [1, 1]} : vector<2x32xf32> to vector<1x32xf32>
    %c0_18 = arith.constant 0 : index
    %c0_19 = arith.constant 0 : index
    %20 = vector.load %arg17[%c0_18, %c0_19] : memref<16x32xf32, #tpu.memory_space<vmem>>, vector<1x32xf32>
    tpu.vector_store %arg17[%c0_18, %c0_19], %19 {strides = array<i32>} : memref<16x32xf32, #tpu.memory_space<vmem>>, vector<1x32xf32>,
    %21 = vector.extract_strided_slice %18 {offsets = [1, 0], sizes = [1, 32], strides = [1, 1]} : vector<2x32xf32> to vector<1x32xf32>
    %c8 = arith.constant 8 : index
    %c0_20 = arith.constant 0 : index
    %22 = vector.load %arg17[%c8, %c0_20] : memref<16x32xf32, #tpu.memory_space<vmem>>, vector<1x32xf32>
    tpu.vector_store %arg17[%c8, %c0_20], %21 {strides = array<i32>} : memref<16x32xf32, #tpu.memory_space<vmem>>, vector<1x32xf32>,
    %23 = vector.extract_strided_slice %5 {offsets = [2, 0], sizes = [2, 32], strides = [1, 1]} : vector<16x32xf32> to vector<2x32xf32>
    %cst_21 = arith.constant dense<0.000000e+00> : vector<2x32xf32>
    %24 = tpu.matmul %18, %12, %cst_21 {dimension_numbers = #tpu.dot_dimension_numbers<[1], [0], [0], [1], [0, 0, 1, 1], [], []>} : vector<2x32xf32>, vector<32x32xf32>, vector<2x32xf32> -> vector<2x32xf32>
    %25 = arith.addf %23, %24 : vector<2x32xf32>
    %26 = math.tanh %25 : vector<2x32xf32>
    %27 = vector.extract_strided_slice %26 {offsets = [0, 0], sizes = [1, 32], strides = [1, 1]} : vector<2x32xf32> to vector<1x32xf32>
    %c1 = arith.constant 1 : index
    %c0_22 = arith.constant 0 : index
    %28 = vector.load %arg17[%c1, %c0_22] : memref<16x32xf32, #tpu.memory_space<vmem>>, vector<1x32xf32>
    tpu.vector_store %arg17[%c1, %c0_22], %27 {strides = array<i32>} : memref<16x32xf32, #tpu.memory_space<vmem>>, vector<1x32xf32>,
    %29 = vector.extract_strided_slice %26 {offsets = [1, 0], sizes = [1, 32], strides = [1, 1]} : vector<2x32xf32> to vector<1x32xf32>
    %c9 = arith.constant 9 : index
    %c0_23 = arith.constant 0 : index
    %30 = vector.load %arg17[%c9, %c0_23] : memref<16x32xf32, #tpu.memory_space<vmem>>, vector<1x32xf32>
    tpu.vector_store %arg17[%c9, %c0_23], %29 {strides = array<i32>} : memref<16x32xf32, #tpu.memory_space<vmem>>, vector<1x32xf32>,
    %31 = vector.extract_strided_slice %5 {offsets = [4, 0], sizes = [2, 32], strides = [1, 1]} : vector<16x32xf32> to vector<2x32xf32>
    %cst_24 = arith.constant dense<0.000000e+00> : vector<2x32xf32>
    %32 = tpu.matmul %26, %12, %cst_24 {dimension_numbers = #tpu.dot_dimension_numbers<[1], [0], [0], [1], [0, 0, 1, 1], [], []>} : vector<2x32xf32>, vector<32x32xf32>, vector<2x32xf32> -> vector<2x32xf32>
    %33 = arith.addf %31, %32 : vector<2x32xf32>
    %34 = math.tanh %33 : vector<2x32xf32>
    %35 = vector.extract_strided_slice %34 {offsets = [0, 0], sizes = [1, 32], strides = [1, 1]} : vector<2x32xf32> to vector<1x32xf32>
    %c2 = arith.constant 2 : index
    %c0_25 = arith.constant 0 : index
    %36 = vector.load %arg17[%c2, %c0_25] : memref<16x32xf32, #tpu.memory_space<vmem>>, vector<1x32xf32>
    tpu.vector_store %arg17[%c2, %c0_25], %35 {strides = array<i32>} : memref<16x32xf32, #tpu.memory_space<vmem>>, vector<1x32xf32>,
    %37 = vector.extract_strided_slice %34 {offsets = [1, 0], sizes = [1, 32], strides = [1, 1]} : vector<2x32xf32> to vector<1x32xf32>
    %c10 = arith.constant 10 : index
    %c0_26 = arith.constant 0 : index
    %38 = vector.load %arg17[%c10, %c0_26] : memref<16x32xf32, #tpu.memory_space<vmem>>, vector<1x32xf32>
    tpu.vector_store %arg17[%c10, %c0_26], %37 {strides = array<i32>} : memref<16x32xf32, #tpu.memory_space<vmem>>, vector<1x32xf32>,
    %39 = vector.extract_strided_slice %5 {offsets = [6, 0], sizes = [2, 32], strides = [1, 1]} : vector<16x32xf32> to vector<2x32xf32>
    %cst_27 = arith.constant dense<0.000000e+00> : vector<2x32xf32>
    %40 = tpu.matmul %34, %12, %cst_27 {dimension_numbers = #tpu.dot_dimension_numbers<[1], [0], [0], [1], [0, 0, 1, 1], [], []>} : vector<2x32xf32>, vector<32x32xf32>, vector<2x32xf32> -> vector<2x32xf32>
    %41 = arith.addf %39, %40 : vector<2x32xf32>
    %42 = math.tanh %41 : vector<2x32xf32>
    %43 = vector.extract_strided_slice %42 {offsets = [0, 0], sizes = [1, 32], strides = [1, 1]} : vector<2x32xf32> to vector<1x32xf32>
    %c3 = arith.constant 3 : index
    %c0_28 = arith.constant 0 : index
    %44 = vector.load %arg17[%c3, %c0_28] : memref<16x32xf32, #tpu.memory_space<vmem>>, vector<1x32xf32>
    tpu.vector_store %arg17[%c3, %c0_28], %43 {strides = array<i32>} : memref<16x32xf32, #tpu.memory_space<vmem>>, vector<1x32xf32>,
    %45 = vector.extract_strided_slice %42 {offsets = [1, 0], sizes = [1, 32], strides = [1, 1]} : vector<2x32xf32> to vector<1x32xf32>
    %c11 = arith.constant 11 : index
    %c0_29 = arith.constant 0 : index
    %46 = vector.load %arg17[%c11, %c0_29] : memref<16x32xf32, #tpu.memory_space<vmem>>, vector<1x32xf32>
    tpu.vector_store %arg17[%c11, %c0_29], %45 {strides = array<i32>} : memref<16x32xf32, #tpu.memory_space<vmem>>, vector<1x32xf32>,
    %47 = vector.extract_strided_slice %5 {offsets = [8, 0], sizes = [2, 32], strides = [1, 1]} : vector<16x32xf32> to vector<2x32xf32>
    %cst_30 = arith.constant dense<0.000000e+00> : vector<2x32xf32>
    %48 = tpu.matmul %42, %12, %cst_30 {dimension_numbers = #tpu.dot_dimension_numbers<[1], [0], [0], [1], [0, 0, 1, 1], [], []>} : vector<2x32xf32>, vector<32x32xf32>, vector<2x32xf32> -> vector<2x32xf32>
    %49 = arith.addf %47, %48 : vector<2x32xf32>
    %50 = math.tanh %49 : vector<2x32xf32>
    %51 = vector.extract_strided_slice %50 {offsets = [0, 0], sizes = [1, 32], strides = [1, 1]} : vector<2x32xf32> to vector<1x32xf32>
    %c4 = arith.constant 4 : index
    %c0_31 = arith.constant 0 : index
    %52 = vector.load %arg17[%c4, %c0_31] : memref<16x32xf32, #tpu.memory_space<vmem>>, vector<1x32xf32>
    tpu.vector_store %arg17[%c4, %c0_31], %51 {strides = array<i32>} : memref<16x32xf32, #tpu.memory_space<vmem>>, vector<1x32xf32>,
    %53 = vector.extract_strided_slice %50 {offsets = [1, 0], sizes = [1, 32], strides = [1, 1]} : vector<2x32xf32> to vector<1x32xf32>
    %c12 = arith.constant 12 : index
    %c0_32 = arith.constant 0 : index
    %54 = vector.load %arg17[%c12, %c0_32] : memref<16x32xf32, #tpu.memory_space<vmem>>, vector<1x32xf32>
    tpu.vector_store %arg17[%c12, %c0_32], %53 {strides = array<i32>} : memref<16x32xf32, #tpu.memory_space<vmem>>, vector<1x32xf32>,
    %55 = vector.extract_strided_slice %5 {offsets = [10, 0], sizes = [2, 32], strides = [1, 1]} : vector<16x32xf32> to vector<2x32xf32>
    %cst_33 = arith.constant dense<0.000000e+00> : vector<2x32xf32>
    %56 = tpu.matmul %50, %12, %cst_33 {dimension_numbers = #tpu.dot_dimension_numbers<[1], [0], [0], [1], [0, 0, 1, 1], [], []>} : vector<2x32xf32>, vector<32x32xf32>, vector<2x32xf32> -> vector<2x32xf32>
    %57 = arith.addf %55, %56 : vector<2x32xf32>
    %58 = math.tanh %57 : vector<2x32xf32>
    %59 = vector.extract_strided_slice %58 {offsets = [0, 0], sizes = [1, 32], strides = [1, 1]} : vector<2x32xf32> to vector<1x32xf32>
    %c5 = arith.constant 5 : index
    %c0_34 = arith.constant 0 : index
    %60 = vector.load %arg17[%c5, %c0_34] : memref<16x32xf32, #tpu.memory_space<vmem>>, vector<1x32xf32>
    tpu.vector_store %arg17[%c5, %c0_34], %59 {strides = array<i32>} : memref<16x32xf32, #tpu.memory_space<vmem>>, vector<1x32xf32>,
    %61 = vector.extract_strided_slice %58 {offsets = [1, 0], sizes = [1, 32], strides = [1, 1]} : vector<2x32xf32> to vector<1x32xf32>
    %c13 = arith.constant 13 : index
    %c0_35 = arith.constant 0 : index
    %62 = vector.load %arg17[%c13, %c0_35] : memref<16x32xf32, #tpu.memory_space<vmem>>, vector<1x32xf32>
    tpu.vector_store %arg17[%c13, %c0_35], %61 {strides = array<i32>} : memref<16x32xf32, #tpu.memory_space<vmem>>, vector<1x32xf32>,
    %63 = vector.extract_strided_slice %5 {offsets = [12, 0], sizes = [2, 32], strides = [1, 1]} : vector<16x32xf32> to vector<2x32xf32>
    %cst_36 = arith.constant dense<0.000000e+00> : vector<2x32xf32>
    %64 = tpu.matmul %58, %12, %cst_36 {dimension_numbers = #tpu.dot_dimension_numbers<[1], [0], [0], [1], [0, 0, 1, 1], [], []>} : vector<2x32xf32>, vector<32x32xf32>, vector<2x32xf32> -> vector<2x32xf32>
    %65 = arith.addf %63, %64 : vector<2x32xf32>
    %66 = math.tanh %65 : vector<2x32xf32>
    %67 = vector.extract_strided_slice %66 {offsets = [0, 0], sizes = [1, 32], strides = [1, 1]} : vector<2x32xf32> to vector<1x32xf32>
    %c6 = arith.constant 6 : index
    %c0_37 = arith.constant 0 : index
    %68 = vector.load %arg17[%c6, %c0_37] : memref<16x32xf32, #tpu.memory_space<vmem>>, vector<1x32xf32>
    tpu.vector_store %arg17[%c6, %c0_37], %67 {strides = array<i32>} : memref<16x32xf32, #tpu.memory_space<vmem>>, vector<1x32xf32>,
    %69 = vector.extract_strided_slice %66 {offsets = [1, 0], sizes = [1, 32], strides = [1, 1]} : vector<2x32xf32> to vector<1x32xf32>
    %c14 = arith.constant 14 : index
    %c0_38 = arith.constant 0 : index
    %70 = vector.load %arg17[%c14, %c0_38] : memref<16x32xf32, #tpu.memory_space<vmem>>, vector<1x32xf32>
    tpu.vector_store %arg17[%c14, %c0_38], %69 {strides = array<i32>} : memref<16x32xf32, #tpu.memory_space<vmem>>, vector<1x32xf32>,
    %71 = vector.extract_strided_slice %5 {offsets = [14, 0], sizes = [2, 32], strides = [1, 1]} : vector<16x32xf32> to vector<2x32xf32>
    %cst_39 = arith.constant dense<0.000000e+00> : vector<2x32xf32>
    %72 = tpu.matmul %66, %12, %cst_39 {dimension_numbers = #tpu.dot_dimension_numbers<[1], [0], [0], [1], [0, 0, 1, 1], [], []>} : vector<2x32xf32>, vector<32x32xf32>, vector<2x32xf32> -> vector<2x32xf32>
    %73 = arith.addf %71, %72 : vector<2x32xf32>
    %74 = math.tanh %73 : vector<2x32xf32>
    %75 = vector.extract_strided_slice %74 {offsets = [0, 0], sizes = [1, 32], strides = [1, 1]} : vector<2x32xf32> to vector<1x32xf32>
    %c7 = arith.constant 7 : index
    %c0_40 = arith.constant 0 : index
    %76 = vector.load %arg17[%c7, %c0_40] : memref<16x32xf32, #tpu.memory_space<vmem>>, vector<1x32xf32>
    tpu.vector_store %arg17[%c7, %c0_40], %75 {strides = array<i32>} : memref<16x32xf32, #tpu.memory_space<vmem>>, vector<1x32xf32>,
    %77 = vector.extract_strided_slice %74 {offsets = [1, 0], sizes = [1, 32], strides = [1, 1]} : vector<2x32xf32> to vector<1x32xf32>
    %c15 = arith.constant 15 : index
    %c0_41 = arith.constant 0 : index
    %78 = vector.load %arg17[%c15, %c0_41] : memref<16x32xf32, #tpu.memory_space<vmem>>, vector<1x32xf32>
    tpu.vector_store %arg17[%c15, %c0_41], %77 {strides = array<i32>} : memref<16x32xf32, #tpu.memory_space<vmem>>, vector<1x32xf32>,
    %79 = vector.extract_strided_slice %11 {offsets = [0, 0], sizes = [2, 32], strides = [1, 1]} : vector<16x32xf32> to vector<2x32xf32>
    %cst_42 = arith.constant dense<0.000000e+00> : vector<2x32xf32>
    %80 = tpu.matmul %74, %13, %cst_42 {dimension_numbers = #tpu.dot_dimension_numbers<[1], [0], [0], [1], [0, 0, 1, 1], [], []>} : vector<2x32xf32>, vector<32x32xf32>, vector<2x32xf32> -> vector<2x32xf32>
    %81 = arith.addf %79, %80 : vector<2x32xf32>
    %82 = math.tanh %81 : vector<2x32xf32>
    %83 = vector.extract_strided_slice %82 {offsets = [0, 0], sizes = [1, 32], strides = [1, 1]} : vector<2x32xf32> to vector<1x32xf32>
    %c0_43 = arith.constant 0 : index
    %c0_44 = arith.constant 0 : index
    %84 = vector.load %arg18[%c0_43, %c0_44] : memref<16x32xf32, #tpu.memory_space<vmem>>, vector<1x32xf32>
    tpu.vector_store %arg18[%c0_43, %c0_44], %83 {strides = array<i32>} : memref<16x32xf32, #tpu.memory_space<vmem>>, vector<1x32xf32>,
    %85 = vector.extract_strided_slice %82 {offsets = [1, 0], sizes = [1, 32], strides = [1, 1]} : vector<2x32xf32> to vector<1x32xf32>
    %c8_45 = arith.constant 8 : index
    %c0_46 = arith.constant 0 : index
    %86 = vector.load %arg18[%c8_45, %c0_46] : memref<16x32xf32, #tpu.memory_space<vmem>>, vector<1x32xf32>
    tpu.vector_store %arg18[%c8_45, %c0_46], %85 {strides = array<i32>} : memref<16x32xf32, #tpu.memory_space<vmem>>, vector<1x32xf32>,
    %87 = vector.extract_strided_slice %11 {offsets = [2, 0], sizes = [2, 32], strides = [1, 1]} : vector<16x32xf32> to vector<2x32xf32>
    %cst_47 = arith.constant dense<0.000000e+00> : vector<2x32xf32>
    %88 = tpu.matmul %82, %13, %cst_47 {dimension_numbers = #tpu.dot_dimension_numbers<[1], [0], [0], [1], [0, 0, 1, 1], [], []>} : vector<2x32xf32>, vector<32x32xf32>, vector<2x32xf32> -> vector<2x32xf32>
    %89 = arith.addf %87, %88 : vector<2x32xf32>
    %90 = math.tanh %89 : vector<2x32xf32>
    %91 = vector.extract_strided_slice %90 {offsets = [0, 0], sizes = [1, 32], strides = [1, 1]} : vector<2x32xf32> to vector<1x32xf32>
    %c1_48 = arith.constant 1 : index
    %c0_49 = arith.constant 0 : index
    %92 = vector.load %arg18[%c1_48, %c0_49] : memref<16x32xf32, #tpu.memory_space<vmem>>, vector<1x32xf32>
    tpu.vector_store %arg18[%c1_48, %c0_49], %91 {strides = array<i32>} : memref<16x32xf32, #tpu.memory_space<vmem>>, vector<1x32xf32>,
    %93 = vector.extract_strided_slice %90 {offsets = [1, 0], sizes = [1, 32], strides = [1, 1]} : vector<2x32xf32> to vector<1x32xf32>
    %c9_50 = arith.constant 9 : index
    %c0_51 = arith.constant 0 : index
    %94 = vector.load %arg18[%c9_50, %c0_51] : memref<16x32xf32, #tpu.memory_space<vmem>>, vector<1x32xf32>
    tpu.vector_store %arg18[%c9_50, %c0_51], %93 {strides = array<i32>} : memref<16x32xf32, #tpu.memory_space<vmem>>, vector<1x32xf32>,
    %95 = vector.extract_strided_slice %11 {offsets = [4, 0], sizes = [2, 32], strides = [1, 1]} : vector<16x32xf32> to vector<2x32xf32>
    %cst_52 = arith.constant dense<0.000000e+00> : vector<2x32xf32>
    %96 = tpu.matmul %90, %13, %cst_52 {dimension_numbers = #tpu.dot_dimension_numbers<[1], [0], [0], [1], [0, 0, 1, 1], [], []>} : vector<2x32xf32>, vector<32x32xf32>, vector<2x32xf32> -> vector<2x32xf32>
    %97 = arith.addf %95, %96 : vector<2x32xf32>
    %98 = math.tanh %97 : vector<2x32xf32>
    %99 = vector.extract_strided_slice %98 {offsets = [0, 0], sizes = [1, 32], strides = [1, 1]} : vector<2x32xf32> to vector<1x32xf32>
    %c2_53 = arith.constant 2 : index
    %c0_54 = arith.constant 0 : index
    %100 = vector.load %arg18[%c2_53, %c0_54] : memref<16x32xf32, #tpu.memory_space<vmem>>, vector<1x32xf32>
    tpu.vector_store %arg18[%c2_53, %c0_54], %99 {strides = array<i32>} : memref<16x32xf32, #tpu.memory_space<vmem>>, vector<1x32xf32>,
    %101 = vector.extract_strided_slice %98 {offsets = [1, 0], sizes = [1, 32], strides = [1, 1]} : vector<2x32xf32> to vector<1x32xf32>
    %c10_55 = arith.constant 10 : index
    %c0_56 = arith.constant 0 : index
    %102 = vector.load %arg18[%c10_55, %c0_56] : memref<16x32xf32, #tpu.memory_space<vmem>>, vector<1x32xf32>
    tpu.vector_store %arg18[%c10_55, %c0_56], %101 {strides = array<i32>} : memref<16x32xf32, #tpu.memory_space<vmem>>, vector<1x32xf32>,
    %103 = vector.extract_strided_slice %11 {offsets = [6, 0], sizes = [2, 32], strides = [1, 1]} : vector<16x32xf32> to vector<2x32xf32>
    %cst_57 = arith.constant dense<0.000000e+00> : vector<2x32xf32>
    %104 = tpu.matmul %98, %13, %cst_57 {dimension_numbers = #tpu.dot_dimension_numbers<[1], [0], [0], [1], [0, 0, 1, 1], [], []>} : vector<2x32xf32>, vector<32x32xf32>, vector<2x32xf32> -> vector<2x32xf32>
    %105 = arith.addf %103, %104 : vector<2x32xf32>
    %106 = math.tanh %105 : vector<2x32xf32>
    %107 = vector.extract_strided_slice %106 {offsets = [0, 0], sizes = [1, 32], strides = [1, 1]} : vector<2x32xf32> to vector<1x32xf32>
    %c3_58 = arith.constant 3 : index
    %c0_59 = arith.constant 0 : index
    %108 = vector.load %arg18[%c3_58, %c0_59] : memref<16x32xf32, #tpu.memory_space<vmem>>, vector<1x32xf32>
    tpu.vector_store %arg18[%c3_58, %c0_59], %107 {strides = array<i32>} : memref<16x32xf32, #tpu.memory_space<vmem>>, vector<1x32xf32>,
    %109 = vector.extract_strided_slice %106 {offsets = [1, 0], sizes = [1, 32], strides = [1, 1]} : vector<2x32xf32> to vector<1x32xf32>
    %c11_60 = arith.constant 11 : index
    %c0_61 = arith.constant 0 : index
    %110 = vector.load %arg18[%c11_60, %c0_61] : memref<16x32xf32, #tpu.memory_space<vmem>>, vector<1x32xf32>
    tpu.vector_store %arg18[%c11_60, %c0_61], %109 {strides = array<i32>} : memref<16x32xf32, #tpu.memory_space<vmem>>, vector<1x32xf32>,
    %111 = vector.extract_strided_slice %11 {offsets = [8, 0], sizes = [2, 32], strides = [1, 1]} : vector<16x32xf32> to vector<2x32xf32>
    %cst_62 = arith.constant dense<0.000000e+00> : vector<2x32xf32>
    %112 = tpu.matmul %106, %13, %cst_62 {dimension_numbers = #tpu.dot_dimension_numbers<[1], [0], [0], [1], [0, 0, 1, 1], [], []>} : vector<2x32xf32>, vector<32x32xf32>, vector<2x32xf32> -> vector<2x32xf32>
    %113 = arith.addf %111, %112 : vector<2x32xf32>
    %114 = math.tanh %113 : vector<2x32xf32>
    %115 = vector.extract_strided_slice %114 {offsets = [0, 0], sizes = [1, 32], strides = [1, 1]} : vector<2x32xf32> to vector<1x32xf32>
    %c4_63 = arith.constant 4 : index
    %c0_64 = arith.constant 0 : index
    %116 = vector.load %arg18[%c4_63, %c0_64] : memref<16x32xf32, #tpu.memory_space<vmem>>, vector<1x32xf32>
    tpu.vector_store %arg18[%c4_63, %c0_64], %115 {strides = array<i32>} : memref<16x32xf32, #tpu.memory_space<vmem>>, vector<1x32xf32>,
    %117 = vector.extract_strided_slice %114 {offsets = [1, 0], sizes = [1, 32], strides = [1, 1]} : vector<2x32xf32> to vector<1x32xf32>
    %c12_65 = arith.constant 12 : index
    %c0_66 = arith.constant 0 : index
    %118 = vector.load %arg18[%c12_65, %c0_66] : memref<16x32xf32, #tpu.memory_space<vmem>>, vector<1x32xf32>
    tpu.vector_store %arg18[%c12_65, %c0_66], %117 {strides = array<i32>} : memref<16x32xf32, #tpu.memory_space<vmem>>, vector<1x32xf32>,
    %119 = vector.extract_strided_slice %11 {offsets = [10, 0], sizes = [2, 32], strides = [1, 1]} : vector<16x32xf32> to vector<2x32xf32>
    %cst_67 = arith.constant dense<0.000000e+00> : vector<2x32xf32>
    %120 = tpu.matmul %114, %13, %cst_67 {dimension_numbers = #tpu.dot_dimension_numbers<[1], [0], [0], [1], [0, 0, 1, 1], [], []>} : vector<2x32xf32>, vector<32x32xf32>, vector<2x32xf32> -> vector<2x32xf32>
    %121 = arith.addf %119, %120 : vector<2x32xf32>
    %122 = math.tanh %121 : vector<2x32xf32>
    %123 = vector.extract_strided_slice %122 {offsets = [0, 0], sizes = [1, 32], strides = [1, 1]} : vector<2x32xf32> to vector<1x32xf32>
    %c5_68 = arith.constant 5 : index
    %c0_69 = arith.constant 0 : index
    %124 = vector.load %arg18[%c5_68, %c0_69] : memref<16x32xf32, #tpu.memory_space<vmem>>, vector<1x32xf32>
    tpu.vector_store %arg18[%c5_68, %c0_69], %123 {strides = array<i32>} : memref<16x32xf32, #tpu.memory_space<vmem>>, vector<1x32xf32>,
    %125 = vector.extract_strided_slice %122 {offsets = [1, 0], sizes = [1, 32], strides = [1, 1]} : vector<2x32xf32> to vector<1x32xf32>
    %c13_70 = arith.constant 13 : index
    %c0_71 = arith.constant 0 : index
    %126 = vector.load %arg18[%c13_70, %c0_71] : memref<16x32xf32, #tpu.memory_space<vmem>>, vector<1x32xf32>
    tpu.vector_store %arg18[%c13_70, %c0_71], %125 {strides = array<i32>} : memref<16x32xf32, #tpu.memory_space<vmem>>, vector<1x32xf32>,
    %127 = vector.extract_strided_slice %11 {offsets = [12, 0], sizes = [2, 32], strides = [1, 1]} : vector<16x32xf32> to vector<2x32xf32>
    %cst_72 = arith.constant dense<0.000000e+00> : vector<2x32xf32>
    %128 = tpu.matmul %122, %13, %cst_72 {dimension_numbers = #tpu.dot_dimension_numbers<[1], [0], [0], [1], [0, 0, 1, 1], [], []>} : vector<2x32xf32>, vector<32x32xf32>, vector<2x32xf32> -> vector<2x32xf32>
    %129 = arith.addf %127, %128 : vector<2x32xf32>
    %130 = math.tanh %129 : vector<2x32xf32>
    %131 = vector.extract_strided_slice %130 {offsets = [0, 0], sizes = [1, 32], strides = [1, 1]} : vector<2x32xf32> to vector<1x32xf32>
    %c6_73 = arith.constant 6 : index
    %c0_74 = arith.constant 0 : index
    %132 = vector.load %arg18[%c6_73, %c0_74] : memref<16x32xf32, #tpu.memory_space<vmem>>, vector<1x32xf32>
    tpu.vector_store %arg18[%c6_73, %c0_74], %131 {strides = array<i32>} : memref<16x32xf32, #tpu.memory_space<vmem>>, vector<1x32xf32>,
    %133 = vector.extract_strided_slice %130 {offsets = [1, 0], sizes = [1, 32], strides = [1, 1]} : vector<2x32xf32> to vector<1x32xf32>
    %c14_75 = arith.constant 14 : index
    %c0_76 = arith.constant 0 : index
    %134 = vector.load %arg18[%c14_75, %c0_76] : memref<16x32xf32, #tpu.memory_space<vmem>>, vector<1x32xf32>
    tpu.vector_store %arg18[%c14_75, %c0_76], %133 {strides = array<i32>} : memref<16x32xf32, #tpu.memory_space<vmem>>, vector<1x32xf32>,
    %135 = vector.extract_strided_slice %11 {offsets = [14, 0], sizes = [2, 32], strides = [1, 1]} : vector<16x32xf32> to vector<2x32xf32>
    %cst_77 = arith.constant dense<0.000000e+00> : vector<2x32xf32>
    %136 = tpu.matmul %130, %13, %cst_77 {dimension_numbers = #tpu.dot_dimension_numbers<[1], [0], [0], [1], [0, 0, 1, 1], [], []>} : vector<2x32xf32>, vector<32x32xf32>, vector<2x32xf32> -> vector<2x32xf32>
    %137 = arith.addf %135, %136 : vector<2x32xf32>
    %138 = math.tanh %137 : vector<2x32xf32>
    %139 = vector.extract_strided_slice %138 {offsets = [0, 0], sizes = [1, 32], strides = [1, 1]} : vector<2x32xf32> to vector<1x32xf32>
    %c7_78 = arith.constant 7 : index
    %c0_79 = arith.constant 0 : index
    %140 = vector.load %arg18[%c7_78, %c0_79] : memref<16x32xf32, #tpu.memory_space<vmem>>, vector<1x32xf32>
    tpu.vector_store %arg18[%c7_78, %c0_79], %139 {strides = array<i32>} : memref<16x32xf32, #tpu.memory_space<vmem>>, vector<1x32xf32>,
    %141 = vector.extract_strided_slice %138 {offsets = [1, 0], sizes = [1, 32], strides = [1, 1]} : vector<2x32xf32> to vector<1x32xf32>
    %c15_80 = arith.constant 15 : index
    %c0_81 = arith.constant 0 : index
    %142 = vector.load %arg18[%c15_80, %c0_81] : memref<16x32xf32, #tpu.memory_space<vmem>>, vector<1x32xf32>
    tpu.vector_store %arg18[%c15_80, %c0_81], %141 {strides = array<i32>} : memref<16x32xf32, #tpu.memory_space<vmem>>, vector<1x32xf32>,
    %c0_82 = arith.constant 0 : index
    %c0_83 = arith.constant 0 : index
    %143 = vector.load %arg16[%c0_82, %c0_83] : memref<2x32xf32, #tpu.memory_space<vmem>>, vector<2x32xf32>
    tpu.vector_store %arg16[%c0_82, %c0_83], %138 {strides = array<i32>} : memref<2x32xf32, #tpu.memory_space<vmem>>, vector<2x32xf32>,
    %c0_84 = arith.constant 0 : index
    %c0_85 = arith.constant 0 : index
    %144 = vector.load %arg18[%c0_84, %c0_85] : memref<16x32xf32, #tpu.memory_space<vmem>>, vector<16x32xf32>
    %c0_86 = arith.constant 0 : index
    %c0_87 = arith.constant 0 : index
    %145 = vector.load %arg9[%c0_86, %c0_87] : memref<32x32xf32, #tpu.memory_space<vmem>>, vector<32x32xf32>
    %cst_88 = arith.constant dense<0.000000e+00> : vector<16x32xf32>
    %146 = tpu.matmul %144, %145, %cst_88 {dimension_numbers = #tpu.dot_dimension_numbers<[1], [0], [0], [1], [0, 0, 1, 1], [], []>} : vector<16x32xf32>, vector<32x32xf32>, vector<16x32xf32> -> vector<16x32xf32>
    %c0_89 = arith.constant 0 : index
    %c0_90 = arith.constant 0 : index
    %147 = vector.load %arg12[%c0_89, %c0_90] : memref<1x32xf32, #tpu.memory_space<vmem>>, vector<1x32xf32>
    %148 = vector.broadcast %147 : vector<1x32xf32> to vector<16x32xf32>
    %149 = arith.addf %146, %148 : vector<16x32xf32>
    %c0_91 = arith.constant 0 : index
    %c0_92 = arith.constant 0 : index
    %150 = vector.load %arg10[%c0_91, %c0_92] : memref<32x32xf32, #tpu.memory_space<vmem>>, vector<32x32xf32>
    %c0_93 = arith.constant 0 : index
    %c0_94 = arith.constant 0 : index
    %151 = vector.load %arg11[%c0_93, %c0_94] : memref<32x32xf32, #tpu.memory_space<vmem>>, vector<32x32xf32>
    %c0_95 = arith.constant 0 : index
    %c0_96 = arith.constant 0 : index
    %152 = vector.load %arg13[%c0_95, %c0_96] : memref<1x32xf32, #tpu.memory_space<vmem>>, vector<1x32xf32>
    %c0_97 = arith.constant 0 : index
    %c0_98 = arith.constant 0 : index
    %153 = vector.load %arg17[%c0_97, %c0_98] : memref<16x32xf32, #tpu.memory_space<vmem>>, vector<8x32xf32>
    %154 = vector.extract_strided_slice %149 {offsets = [0, 0], sizes = [8, 32], strides = [1, 1]} : vector<16x32xf32> to vector<8x32xf32>
    %155 = vector.extract_strided_slice %144 {offsets = [0, 0], sizes = [8, 32], strides = [1, 1]} : vector<16x32xf32> to vector<8x32xf32>
    %cst_99 = arith.constant dense<0.000000e+00> : vector<8x8xf32>
    %156 = tpu.matmul %154, %153, %cst_99 {dimension_numbers = #tpu.dot_dimension_numbers<[1], [1], [0], [0], [0, 0, 1, 0], [], []>} : vector<8x32xf32>, vector<8x32xf32>, vector<8x8xf32> -> vector<8x8xf32>
    %cst_100 = arith.constant dense<0xFF800000> : vector<8xf32>
    %157 = vector.multi_reduction <maximumf>, %156, %cst_100 [1] : vector<8x8xf32> to vector<8xf32>
    %158 = vector.shape_cast %157 : vector<8xf32> to vector<8x1xf32>
    %159 = vector.broadcast %158 : vector<8x1xf32> to vector<8x8xf32>
    %160 = arith.subf %156, %159 : vector<8x8xf32>
    %161 = math.exp %160 : vector<8x8xf32>
    %cst_101 = arith.constant dense<0.000000e+00> : vector<8xf32>
    %162 = vector.multi_reduction <add>, %161, %cst_101 [1] : vector<8x8xf32> to vector<8xf32>
    %163 = vector.shape_cast %162 : vector<8xf32> to vector<8x1xf32>
    %164 = vector.broadcast %163 : vector<8x1xf32> to vector<8x8xf32>
    %165 = arith.divf %161, %164 : vector<8x8xf32>
    %cst_102 = arith.constant dense<0.000000e+00> : vector<8x32xf32>
    %166 = tpu.matmul %165, %153, %cst_102 {dimension_numbers = #tpu.dot_dimension_numbers<[1], [0], [0], [1], [0, 0, 1, 1], [], []>} : vector<8x8xf32>, vector<8x32xf32>, vector<8x32xf32> -> vector<8x32xf32>
    %cst_103 = arith.constant dense<0.000000e+00> : vector<8x32xf32>
    %167 = tpu.matmul %166, %150, %cst_103 {dimension_numbers = #tpu.dot_dimension_numbers<[1], [0], [0], [1], [0, 0, 1, 1], [], []>} : vector<8x32xf32>, vector<32x32xf32>, vector<8x32xf32> -> vector<8x32xf32>
    %cst_104 = arith.constant dense<0.000000e+00> : vector<8x32xf32>
    %168 = tpu.matmul %155, %151, %cst_104 {dimension_numbers = #tpu.dot_dimension_numbers<[1], [0], [0], [1], [0, 0, 1, 1], [], []>} : vector<8x32xf32>, vector<32x32xf32>, vector<8x32xf32> -> vector<8x32xf32>
    %169 = arith.addf %167, %168 : vector<8x32xf32>
    %170 = vector.broadcast %152 : vector<1x32xf32> to vector<8x32xf32>
    %171 = arith.addf %169, %170 : vector<8x32xf32>
    %172 = math.tanh %171 : vector<8x32xf32>
    %c0_105 = arith.constant 0 : index
    %c0_106 = arith.constant 0 : index
    %173 = vector.load %arg14[%c0_105, %c0_106] : memref<16x32xf32, #tpu.memory_space<vmem>>, vector<8x32xf32>
    tpu.vector_store %arg14[%c0_105, %c0_106], %172 {strides = array<i32>} : memref<16x32xf32, #tpu.memory_space<vmem>>, vector<8x32xf32>,
    %c0_107 = arith.constant 0 : index
    %c0_108 = arith.constant 0 : index
    %174 = vector.load %arg15[%c0_107, %c0_108] : memref<16x8xf32, #tpu.memory_space<vmem>>, vector<8x8xf32>
    tpu.vector_store %arg15[%c0_107, %c0_108], %165 {strides = array<i32>} : memref<16x8xf32, #tpu.memory_space<vmem>>, vector<8x8xf32>,
    %c8_109 = arith.constant 8 : index
    %c0_110 = arith.constant 0 : index
    %175 = vector.load %arg17[%c8_109, %c0_110] : memref<16x32xf32, #tpu.memory_space<vmem>>, vector<8x32xf32>
    %176 = vector.extract_strided_slice %149 {offsets = [8, 0], sizes = [8, 32], strides = [1, 1]} : vector<16x32xf32> to vector<8x32xf32>
    %177 = vector.extract_strided_slice %144 {offsets = [8, 0], sizes = [8, 32], strides = [1, 1]} : vector<16x32xf32> to vector<8x32xf32>
    %cst_111 = arith.constant dense<0.000000e+00> : vector<8x8xf32>
    %178 = tpu.matmul %176, %175, %cst_111 {dimension_numbers = #tpu.dot_dimension_numbers<[1], [1], [0], [0], [0, 0, 1, 0], [], []>} : vector<8x32xf32>, vector<8x32xf32>, vector<8x8xf32> -> vector<8x8xf32>
    %cst_112 = arith.constant dense<0xFF800000> : vector<8xf32>
    %179 = vector.multi_reduction <maximumf>, %178, %cst_112 [1] : vector<8x8xf32> to vector<8xf32>
    %180 = vector.shape_cast %179 : vector<8xf32> to vector<8x1xf32>
    %181 = vector.broadcast %180 : vector<8x1xf32> to vector<8x8xf32>
    %182 = arith.subf %178, %181 : vector<8x8xf32>
    %183 = math.exp %182 : vector<8x8xf32>
    %cst_113 = arith.constant dense<0.000000e+00> : vector<8xf32>
    %184 = vector.multi_reduction <add>, %183, %cst_113 [1] : vector<8x8xf32> to vector<8xf32>
    %185 = vector.shape_cast %184 : vector<8xf32> to vector<8x1xf32>
    %186 = vector.broadcast %185 : vector<8x1xf32> to vector<8x8xf32>
    %187 = arith.divf %183, %186 : vector<8x8xf32>
    %cst_114 = arith.constant dense<0.000000e+00> : vector<8x32xf32>
    %188 = tpu.matmul %187, %175, %cst_114 {dimension_numbers = #tpu.dot_dimension_numbers<[1], [0], [0], [1], [0, 0, 1, 1], [], []>} : vector<8x8xf32>, vector<8x32xf32>, vector<8x32xf32> -> vector<8x32xf32>
    %cst_115 = arith.constant dense<0.000000e+00> : vector<8x32xf32>
    %189 = tpu.matmul %188, %150, %cst_115 {dimension_numbers = #tpu.dot_dimension_numbers<[1], [0], [0], [1], [0, 0, 1, 1], [], []>} : vector<8x32xf32>, vector<32x32xf32>, vector<8x32xf32> -> vector<8x32xf32>
    %cst_116 = arith.constant dense<0.000000e+00> : vector<8x32xf32>
    %190 = tpu.matmul %177, %151, %cst_116 {dimension_numbers = #tpu.dot_dimension_numbers<[1], [0], [0], [1], [0, 0, 1, 1], [], []>} : vector<8x32xf32>, vector<32x32xf32>, vector<8x32xf32> -> vector<8x32xf32>
    %191 = arith.addf %189, %190 : vector<8x32xf32>
    %192 = vector.broadcast %152 : vector<1x32xf32> to vector<8x32xf32>
    %193 = arith.addf %191, %192 : vector<8x32xf32>
    %194 = math.tanh %193 : vector<8x32xf32>
    %c8_117 = arith.constant 8 : index
    %c0_118 = arith.constant 0 : index
    %195 = vector.load %arg14[%c8_117, %c0_118] : memref<16x32xf32, #tpu.memory_space<vmem>>, vector<8x32xf32>
    tpu.vector_store %arg14[%c8_117, %c0_118], %194 {strides = array<i32>} : memref<16x32xf32, #tpu.memory_space<vmem>>, vector<8x32xf32>,
    %c8_119 = arith.constant 8 : index
    %c0_120 = arith.constant 0 : index
    %196 = vector.load %arg15[%c8_119, %c0_120] : memref<16x8xf32, #tpu.memory_space<vmem>>, vector<8x8xf32>
    tpu.vector_store %arg15[%c8_119, %c0_120], %187 {strides = array<i32>} : memref<16x8xf32, #tpu.memory_space<vmem>>, vector<8x8xf32>,
    return
  }
}

</mosaic_0001>

<bundles_post_ra>
// kernel: tpu_custom_call.1
= control target key start
LH: loop header
LB: loop body
LE: loop exit
PB: predicated region body
PF: predicated region fallthrough
CT: control target
= control target key end

     0   :  { %s3913_s0 = inlined_call_operand.hbm [shape: f32[16,32], index: 0, kind: input, shape index: {}]   ;;  %s3914_s1 = inlined_call_operand.hbm [shape: f32[16,32], index: 1, kind: input, shape index: {}]   ;;  %s3915_s2 = inlined_call_operand.vmem [shape: f32[2,32], index: 2, kind: input, shape index: {}]   ;;  %s3916_s3 = inlined_call_operand.hbm [shape: f32[32,32], index: 3, kind: input, shape index: {}]   ;;  %s3917_s4 = inlined_call_operand.hbm [shape: f32[32,32], index: 4, kind: input, shape index: {}]   ;;  %s3918_s5 = inlined_call_operand.hbm [shape: f32[1,32], index: 5, kind: input, shape index: {}]   ;;  %s3919_s6 = inlined_call_operand.hbm [shape: f32[32,32], index: 6, kind: input, shape index: {}]   ;;  %s3920_s7 = inlined_call_operand.hbm [shape: f32[32,32], index: 7, kind: input, shape index: {}]   ;;  %s3921_s8 = inlined_call_operand.hbm [shape: f32[1,32], index: 8, kind: input, shape index: {}]   ;;  %s3922_s9 = inlined_call_operand.vmem [shape: f32[32,32], index: 9, kind: input, shape index: {}]   ;;  %s3923_s10 = inlined_call_operand.hbm [shape: f32[32,32], index: 10, kind: input, shape index: {}]   ;;  %s3924_s11 = inlined_call_operand.hbm [shape: f32[32,32], index: 11, kind: input, shape index: {}]   ;;  %s3925_s12 = inlined_call_operand.vmem [shape: f32[1,32], index: 12, kind: input, shape index: {}]   ;;  %s3926_s13 = inlined_call_operand.vmem [shape: f32[1,32], index: 13, kind: input, shape index: {}]   ;;  %s3927_s14 = inlined_call_operand.hbm [shape: f32[16,32], index: 14, kind: output, shape index: {0}]   ;;  %s3928_s15 = inlined_call_operand.vmem [shape: f32[16,8], index: 15, kind: output, shape index: {1}]   ;;  %s3929_s16 = inlined_call_operand.hbm [shape: f32[2,32], index: 16, kind: output, shape index: {2}]  }
   0x1   :  { %3931 = sst [smem:[#allocation32_spill]] %s3913_s0 }
   0x2   :  { %22 = vsyncpa [#allocation5], 0 }
   0x3   :  { %23 = vsyncpa [#allocation8], 0 }
   0x4   :  { %24 = vsyncpa [#allocation11], 0 }
   0x5   :  { %25 = vsyncpa [#allocation14], 0 }
   0x6   :  { %26 = vsyncpa [#allocation17], 0 }
   0x7   :  { %27 = vsyncpa [#allocation20], 0 }
   0x8   :  { %28 = vsyncpa [#allocation6], 0 }
   0x9   :  { %29 = vsyncpa [#allocation23], 0  ;;  %s3355_s20 = smov [#allocation7]   ;;  %s3356_s21 = smov [#allocation10]  }
   0xa   :  { %s47_s2 = sshll.u32 %s3355_s20, 4  ;;  %s73_s22 = sshll.u32 %s3356_s21, 4  ;;  %s48_s2 = int_to_ptr.vmem [resolvable:$true] %s47_s2  ;;  %s3457_s22 = int_to_ptr.vmem [resolvable:$true] %s73_s22 }
   0xb   :  { %s3075_s25 = scalar_lea.hbm %s3914_s1, 256 }
   0xc   :  { %p3076_p0 = scmp.ne.s32.totalorder %s3914_s1, %s3075_s25  ;;  %p3079_p1 = scmp.lt.u32.totalorder %s3075_s25, %s3914_s1 }
   0xe   :  { %p3081_p2 = pnand %p3079_p1, %p3076_p0 }
  0x10   :  { %3084 = shalt.err (!%p3081_p2)
}
  0x11   :  { %s3085_s0 = scalar_lea.vmem %s48_s2, 256  ;;  %p3090_p4 = scmp.lt.s32.totalorder %s48_s2, %s48_s2 }
  0x12   :  { %p3086_p3 = scmp.ne.s32.totalorder %s48_s2, %s3085_s0  ;;  %p3091_p5 = scmp.lt.s32.totalorder %s3085_s0, %s3085_s0 }
  0x14   :  { %p3092_p6 = por %p3091_p5, %p3090_p4 }
  0x16   :  { %p3093_p7 = pnand %p3092_p6, %p3086_p3 }
  0x18   :  { %3096 = shalt.err (!%p3093_p7)
}
  0x19   :  { %s3357_s30 = smov 128   ;;  %s3358_s17 = smov 8  }
  0x1a   :  { %53 = dma.hbm_to_vmem [thread:$0]  %s3914_s1, 256, %s48_s2, [#allocation8], %s3357_s30, %s3357_s30, %s3358_s17  }
  0x1b   :  { %s3097_s23 = scalar_lea.hbm %s3917_s4, 512 }
  0x1c   :  { %p3098_p8 = scmp.ne.s32.totalorder %s3917_s4, %s3097_s23  ;;  %p3101_p9 = scmp.lt.u32.totalorder %s3097_s23, %s3917_s4 }
  0x1e   :  { %p3103_p10 = pnand %p3101_p9, %p3098_p8 }
  0x20   :  { %3106 = shalt.err (!%p3103_p10)
}
  0x21   :  { %s3107_s28 = scalar_lea.vmem %s3457_s22, 512  ;;  %p3112_p12 = scmp.lt.s32.totalorder %s3457_s22, %s3457_s22 }
  0x22   :  { %p3108_p11 = scmp.ne.s32.totalorder %s3457_s22, %s3107_s28  ;;  %p3113_p13 = scmp.lt.s32.totalorder %s3107_s28, %s3107_s28 }
  0x24   :  { %p3114_p0 = por %p3113_p13, %p3112_p12 }
  0x26   :  { %p3115_p1 = pnand %p3114_p0, %p3108_p11 }
  0x28   :  { %3118 = shalt.err (!%p3115_p1)
}
  0x29   :  { %79 = dma.hbm_to_vmem [thread:$0]  %s3917_s4, 512, %s3457_s22, [#allocation11], %s3357_s30, %s3357_s30, %s3358_s17  }
  0x2a   :  { %s3359_s29 = smov [#allocation13]   ;;  %s3360_s18 = smov [#allocation16]  }
  0x2b   :  { %s95_s0 = sshll.u32 %s3359_s29, 4  ;;  %s120_s19 = sshll.u32 %s3360_s18, 4  ;;  %s96_s0 = int_to_ptr.vmem [resolvable:$true] %s95_s0  ;;  %s121_s19 = int_to_ptr.vmem [resolvable:$true] %s120_s19 }
  0x2c   :  { %s3119_s23 = scalar_lea.hbm %s3919_s6, 512 }
  0x2d   :  { %p3120_p2 = scmp.ne.s32.totalorder %s3919_s6, %s3119_s23  ;;  %p3123_p3 = scmp.lt.u32.totalorder %s3119_s23, %s3919_s6 }
  0x2f   :  { %p3125_p4 = pnand %p3123_p3, %p3120_p2 }
  0x31   :  { %3128 = shalt.err (!%p3125_p4)
}
  0x32   :  { %s3129_s4 = scalar_lea.vmem %s96_s0, 512  ;;  %p3134_p6 = scmp.lt.s32.totalorder %s96_s0, %s96_s0 }
  0x33   :  { %p3130_p5 = scmp.ne.s32.totalorder %s96_s0, %s3129_s4  ;;  %p3135_p7 = scmp.lt.s32.totalorder %s3129_s4, %s3129_s4 }
  0x35   :  { %p3136_p8 = por %p3135_p7, %p3134_p6 }
  0x37   :  { %p3137_p9 = pnand %p3136_p8, %p3130_p5 }
  0x39   :  { %3140 = shalt.err (!%p3137_p9)
}
  0x3a   :  { %101 = dma.hbm_to_vmem [thread:$0]  %s3919_s6, 512, %s96_s0, [#allocation14], %s3357_s30, %s3357_s30, %s3358_s17  }
  0x3b   :  { %s3141_s29 = scalar_lea.hbm %s3921_s8, 16 }
  0x3c   :  { %p3142_p10 = scmp.ne.s32.totalorder %s3921_s8, %s3141_s29  ;;  %p3145_p11 = scmp.lt.u32.totalorder %s3141_s29, %s3921_s8 }
  0x3e   :  { %p3147_p12 = pnand %p3145_p11, %p3142_p10 }
  0x40   :  { %3150 = shalt.err (!%p3147_p12)
}
  0x41   :  { %s3151_s24 = scalar_lea.vmem %s121_s19, 16  ;;  %s3155_s25 = scalar_lea.vmem %s121_s19, 32 }
  0x42   :  { %p3152_p13 = scmp.ne.s32.totalorder %s121_s19, %s3151_s24  ;;  %p3156_p0 = scmp.lt.s32.totalorder %s121_s19, %s121_s19 }
  0x43   :  { %p3157_p1 = scmp.lt.s32.totalorder %s3155_s25, %s3151_s24 }
  0x45   :  { %p3158_p2 = por %p3157_p1, %p3156_p0 }
  0x47   :  { %p3159_p3 = pnand %p3158_p2, %p3152_p13 }
  0x49   :  { %3162 = shalt.err (!%p3159_p3)
}
  0x4a   :  { %123 = dma.hbm_to_vmem [thread:$0]  %s3921_s8, 16, %s121_s19, [#allocation17]  }
  0x4b   :  { %s3361_s26 = smov [#allocation4]   ;;  %s3362_s4 = smov [#allocation9]  }
  0x4c   :  { %s35_s27 = sshll.u32 %s3361_s26, 4  ;;  %s61_s22 = sshll.u32 %s3362_s4, 4  ;;  %s36_s27 = int_to_ptr.vmem [resolvable:$true] %s35_s27  ;;  %s3521_s22 = int_to_ptr.vmem [resolvable:$true] %s61_s22 }
  0x4d   :  { %s3932_s2 = sld [smem:[#allocation32_spill]] }
  0x53   :  { %s3163_s29 = scalar_lea.hbm %s3932_s2, 256 }
  0x54   :  { %p3164_p4 = scmp.ne.s32.totalorder %s3932_s2, %s3163_s29  ;;  %p3167_p5 = scmp.lt.u32.totalorder %s3163_s29, %s3932_s2 }
  0x56   :  { %p3169_p6 = pnand %p3167_p5, %p3164_p4 }
  0x58   :  { %3172 = shalt.err (!%p3169_p6)
}
  0x59   :  { %s3173_s8 = scalar_lea.vmem %s36_s27, 256  ;;  %p3178_p8 = scmp.lt.s32.totalorder %s36_s27, %s36_s27 }
  0x5a   :  { %p3174_p7 = scmp.ne.s32.totalorder %s36_s27, %s3173_s8  ;;  %p3179_p9 = scmp.lt.s32.totalorder %s3173_s8, %s3173_s8 }
  0x5c   :  { %p3180_p10 = por %p3179_p9, %p3178_p8 }
  0x5e   :  { %p3181_p11 = pnand %p3180_p10, %p3174_p7 }
  0x60   :  { %3184 = shalt.err (!%p3181_p11)
}
  0x61   :  { %41 = dma.hbm_to_vmem [thread:$0]  %s3932_s2, 256, %s36_s27, [#allocation5], %s3357_s30, %s3357_s30, %s3358_s17  }
  0x62   :  { %s3185_s0 = scalar_lea.hbm %s3916_s3, 512 }
  0x63   :  { %p3186_p12 = scmp.ne.s32.totalorder %s3916_s3, %s3185_s0  ;;  %p3189_p13 = scmp.lt.u32.totalorder %s3185_s0, %s3916_s3 }
  0x65   :  { %p3191_p0 = pnand %p3189_p13, %p3186_p12 }
  0x67   :  { %3194 = shalt.err (!%p3191_p0)
}
  0x68   :  { %s3195_s29 = scalar_lea.vmem %s3521_s22, 512  ;;  %p3200_p2 = scmp.lt.s32.totalorder %s3521_s22, %s3521_s22 }
  0x69   :  { %p3196_p1 = scmp.ne.s32.totalorder %s3521_s22, %s3195_s29  ;;  %p3201_p3 = scmp.lt.s32.totalorder %s3195_s29, %s3195_s29 }
  0x6b   :  { %p3202_p4 = por %p3201_p3, %p3200_p2 }
  0x6d   :  { %p3203_p5 = pnand %p3202_p4, %p3196_p1 }
  0x6f   :  { %3206 = shalt.err (!%p3203_p5)
}
  0x70   :  { %67 = dma.hbm_to_vmem [thread:$0]  %s3916_s3, 512, %s3521_s22, [#allocation8], %s3357_s30, %s3357_s30, %s3358_s17  }
  0x71   :  { %s3363_s18 = smov [#allocation12]   ;;  %s3364_s21 = smov [#allocation15]  }
  0x72   :  { %s86_s20 = sshll.u32 %s3363_s18, 4  ;;  %s107_s23 = sshll.u32 %s3364_s21, 4  ;;  %s87_s20 = int_to_ptr.vmem [resolvable:$true] %s86_s20  ;;  %s3558_s23 = int_to_ptr.vmem [resolvable:$true] %s107_s23 }
  0x73   :  { %s3207_s24 = scalar_lea.hbm %s3918_s5, 16 }
  0x74   :  { %p3208_p6 = scmp.ne.s32.totalorder %s3918_s5, %s3207_s24  ;;  %p3211_p7 = scmp.lt.u32.totalorder %s3207_s24, %s3918_s5 }
  0x76   :  { %p3213_p8 = pnand %p3211_p7, %p3208_p6 }
  0x78   :  { %3216 = shalt.err (!%p3213_p8)
}
  0x79   :  { %s3217_s3 = scalar_lea.vmem %s87_s20, 16  ;;  %s3221_s22 = scalar_lea.vmem %s87_s20, 32 }
  0x7a   :  { %p3218_p9 = scmp.ne.s32.totalorder %s87_s20, %s3217_s3  ;;  %p3222_p10 = scmp.lt.s32.totalorder %s87_s20, %s87_s20 }
  0x7b   :  { %p3223_p11 = scmp.lt.s32.totalorder %s3221_s22, %s3217_s3 }
  0x7d   :  { %p3224_p12 = por %p3223_p11, %p3222_p10 }
  0x7f   :  { %p3225_p13 = pnand %p3224_p12, %p3218_p9 }
  0x81   :  { %3228 = shalt.err (!%p3225_p13)
}
  0x82   :  { %89 = dma.hbm_to_vmem [thread:$0]  %s3918_s5, 16, %s87_s20, [#allocation11]  }
  0x83   :  { %s3229_s27 = scalar_lea.hbm %s3920_s7, 512 }
  0x84   :  { %p3230_p0 = scmp.ne.s32.totalorder %s3920_s7, %s3229_s27  ;;  %p3233_p1 = scmp.lt.u32.totalorder %s3229_s27, %s3920_s7 }
  0x86   :  { %p3235_p2 = pnand %p3233_p1, %p3230_p0 }
  0x88   :  { %3238 = shalt.err (!%p3235_p2)
}
  0x89   :  { %s3239_s19 = scalar_lea.vmem %s3558_s23, 512  ;;  %p3244_p4 = scmp.lt.s32.totalorder %s3558_s23, %s3558_s23 }
  0x8a   :  { %p3240_p3 = scmp.ne.s32.totalorder %s3558_s23, %s3239_s19  ;;  %p3245_p5 = scmp.lt.s32.totalorder %s3239_s19, %s3239_s19 }
  0x8c   :  { %p3246_p6 = por %p3245_p5, %p3244_p4 }
  0x8e   :  { %p3247_p7 = pnand %p3246_p6, %p3240_p3 }
  0x90   :  { %3250 = shalt.err (!%p3247_p7)
}
  0x91   :  { %113 = dma.hbm_to_vmem [thread:$0]  %s3920_s7, 512, %s3558_s23, [#allocation14], %s3357_s30, %s3357_s30, %s3358_s17  }
  0x92   :  { %s3365_s24 = smov [#allocation18]   ;;  %s3366_s6 = smov [#allocation19]  }
  0x93   :  { %s131_s25 = sshll.u32 %s3365_s24, 4  ;;  %s143_s0 = sshll.u32 %s3366_s6, 4  ;;  %s132_s25 = int_to_ptr.vmem [resolvable:$true] %s131_s25  ;;  %s3592_s0 = int_to_ptr.vmem [resolvable:$true] %s143_s0 }
  0x94   :  { %s3251_s22 = scalar_lea.hbm %s3923_s10, 512 }
  0x95   :  { %p3252_p8 = scmp.ne.s32.totalorder %s3923_s10, %s3251_s22  ;;  %p3255_p9 = scmp.lt.u32.totalorder %s3251_s22, %s3923_s10 }
  0x97   :  { %p3257_p10 = pnand %p3255_p9, %p3252_p8 }
  0x99   :  { %3260 = shalt.err (!%p3257_p10)
}
  0x9a   :  { %s3261_s7 = scalar_lea.vmem %s132_s25, 512  ;;  %p3266_p12 = scmp.lt.s32.totalorder %s132_s25, %s132_s25 }
  0x9b   :  { %p3262_p11 = scmp.ne.s32.totalorder %s132_s25, %s3261_s7  ;;  %p3267_p13 = scmp.lt.s32.totalorder %s3261_s7, %s3261_s7 }
  0x9d   :  { %p3268_p0 = por %p3267_p13, %p3266_p12 }
  0x9f   :  { %p3269_p1 = pnand %p3268_p0, %p3262_p11 }
  0xa1   :  { %3272 = shalt.err (!%p3269_p1)
}
  0xa2   :  { %137 = dma.hbm_to_vmem [thread:$0]  %s3923_s10, 512, %s132_s25, [#allocation17], %s3357_s30, %s3357_s30, %s3358_s17  }
  0xa3   :  { %s3273_s21 = scalar_lea.hbm %s3924_s11, 512 }
  0xa4   :  { %p3274_p2 = scmp.ne.s32.totalorder %s3924_s11, %s3273_s21  ;;  %p3277_p3 = scmp.lt.u32.totalorder %s3273_s21, %s3924_s11 }
  0xa6   :  { %p3279_p4 = pnand %p3277_p3, %p3274_p2 }
  0xa8   :  { %3282 = shalt.err (!%p3279_p4)
}
  0xa9   :  { %s3283_s24 = scalar_lea.vmem %s3592_s0, 512  ;;  %p3288_p6 = scmp.lt.s32.totalorder %s3592_s0, %s3592_s0 }
  0xaa   :  { %p3284_p5 = scmp.ne.s32.totalorder %s3592_s0, %s3283_s24  ;;  %p3289_p7 = scmp.lt.s32.totalorder %s3283_s24, %s3283_s24 }
  0xac   :  { %p3290_p8 = por %p3289_p7, %p3288_p6 }
  0xae   :  { %p3291_p9 = pnand %p3290_p8, %p3284_p5 }
  0xb0   :  { %3294 = shalt.err (!%p3291_p9)
}
  0xb1   :  { %149 = dma.hbm_to_vmem [thread:$0]  %s3924_s11, 512, %s3592_s0, [#allocation20], %s3357_s30, %s3357_s30, %s3358_s17  }
  0xb2   :  { %3339 = dma.done.wait [#allocation5], 256  }
  0xb3   :  { %3340 = vsyncadd [#allocation5], 4294967040 }
  0xb4   :  { %3341 = dma.done.wait [#allocation8], 768  }
  0xb5   :  { %3342 = vsyncadd [#allocation8], 4294966528 }
  0xb6   :  { %3343 = dma.done.wait [#allocation11], 528  }
  0xb7   :  { %3344 = vsyncadd [#allocation11], 4294966768 }
  0xb8   :  { %3345 = dma.done.wait [#allocation14], 1024  }
  0xb9   :  { %3346 = vsyncadd [#allocation14], 4294966272 }
  0xba   :  { %3347 = dma.done.wait [#allocation17], 528  }
  0xbb   :  { %3348 = vsyncadd [#allocation17], 4294966768 }
  0xbc   :  { %3349 = dma.done.wait [#allocation20], 512  }
  0xbd   :  { %3350 = vsyncadd [#allocation20], 4294966784  ;;  %vm197_vm0 = vcmask 261120   ;;  %v186_v0 = vld [vmem:[#allocation9] sm:$0xff]  ;;  %v187_v1 = vld [vmem:[#allocation9 + $0x8] sm:$0xff]  ;;  %v3367_v11 = vmov 0.0|0.0  }
  0xbe   :  { %v188_v2 = vld [vmem:[#allocation9 + $0x10] sm:$0xff]  ;;  %v2870_v3 = vpack.c.bf16 %v187_v1, %v186_v0  ;;  %v189_v4 = vld [vmem:[#allocation9 + $0x18] sm:$0xff]  ;;  %v184_v5 = vld [vmem:[#allocation4] sm:$0xff]  ;;  %vm3368_vm1 = vmmov 0   ;;  %v3369_v15 = vmov 0.0   ;;  %vm456_vm2 = vcmask 253952  }
  0xbf   :  { %v2874_v6 = vpack.c.bf16 %v189_v4, %v188_v2  ;;  %2605 = vmatprep.mubr.msk.f32.mxu0 %vm197_vm0, %v184_v5  ;;  %v373_v7 = vld [vmem:[#allocation10] sm:$0xff]  ;;  %v374_v8 = vld [vmem:[#allocation10 + $0x8] sm:$0xff]  ;;  %v375_v12 = vld [vmem:[#allocation10 + $0x10] sm:$0xff]  ;;  %vm458_vm3 = vcmask 254977   ;;  %vm538_vm4 = vcmask 256002   ;;  %vm540_vm5 = vcmask 257027  }
  0xc0   :  { %2871 = vmatprep.subr.bf16.mxu0 %v2870_v3  ;;  %v185_v9 = vld [vmem:[#allocation4 + $0x8] sm:$0xff]  ;;  %v3630_v10 = vpack.c.bf16 %v374_v8, %v373_v7  ;;  %v376_v13 = vld [vmem:[#allocation10 + $0x18] sm:$0xff]  ;;  %v279_v22 = vld [vmem:[#allocation7] sm:$0xff]  ;;  %vm621_vm6 = vcmask 258052   ;;  %vm623_vm7 = vcmask 259077   ;;  %vm704_vm8 = vcmask 260102  }
  0xc1   :  { %2873 = vmatpush3.bf16.msra.mxu0 %v2870_v3  ;;  %v3635_v14 = vpack.c.bf16 %v376_v13, %v375_v12  ;;  %v281_v16 = vld [vmem:[#allocation13] sm:$0xff]  ;;  %v282_v17 = vld [vmem:[#allocation13 + $0x8] sm:$0xff]  ;;  %v283_v19 = vld [vmem:[#allocation13 + $0x10] sm:$0xff]  ;;  %2616 = vmatprep.mubr.msk.f32.mxu1 %vm197_vm0, %v279_v22  ;;  %vm706_vm9 = vcmask 261127   ;;  %vm1668_vm10 = vcmask 261126   ;;  %vm1850_vm11 = vcmask 64512  }
  0xc2   :  { %2875 = vmatprep.subr.bf16.mxu0 %v2874_v6  ;;  %v2878_v18 = vpack.c.bf16 %v282_v17, %v281_v16  ;;  %v284_v20 = vld [vmem:[#allocation13 + $0x18] sm:$0xff]  ;;  %v3669_v33 = vld [vmem:[#allocation16] ss:$0 sm:$0xff]  ;;  %v378_v8 = vld [vmem:[#allocation15 + $0x8] sm:$0xff]  ;;  %s3370_s2 = smov [#allocation22]  }
  0xc3   :  { %v2882_v21 = vpack.c.bf16 %v284_v20, %v283_v19  ;;  %v280_v23 = vld [vmem:[#allocation7 + $0x8] sm:$0xff]  ;;  %v2436_v24 = vld [vmem:[#allocation12] ss:$0 sm:$0xff]  ;;  %v377_v7 = vld [vmem:[#allocation15] sm:$0xff]  ;;  %s2416_s18 = sshll.u32 %s3370_s2, 4  ;;  %s2417_s18 = int_to_ptr.vmem [resolvable:$true] %s2416_s18 }
  0xc4   :  { %2879 = vmatprep.subr.bf16.mxu1 %v2878_v18  ;;  %v380_v12 = vld [vmem:[#allocation15 + $0x18] sm:$0xff]  ;;  %s3295_s21 = scalar_lea.vmem %s2417_s18, 32  ;;  %p3300_p11 = scmp.lt.s32.totalorder %s2417_s18, %s2417_s18 }
  0xc5   :  { %2877 = vmatpush3.bf16.msra.mxu0 %v2874_v6  ;;  %2881 = vmatpush3.bf16.msra.mxu1 %v2878_v18  ;;  %p3296_p10 = scmp.ne.s32.totalorder %s2417_s18, %s3295_s21  ;;  %p3301_p12 = scmp.lt.s32.totalorder %s3295_s21, %s3295_s21 }
  0xc6   :  { %2886 = vmatprep.subr.bf16.mxu0 %v3367_v11  ;;  %2883 = vmatprep.subr.bf16.mxu1 %v2882_v21 }
  0xc7   :  { %p3302_p13 = por %p3301_p12, %p3300_p11 }
  0xc8   :  { %2606 = vmatmul.mubr.msk.f32.vlgmr.msra.gmra.mrb[0].mxu0 %vm197_vm0, %v185_v9  ;;  %v3725_v9 = vpack.c.bf16 %v378_v8, %v377_v7 }
  0xc9   :  { %2888 = vmatpush3.bf16.msra.mxu0 %v3630_v10  ;;  %2627 = vmatprep.mubr.msk.f32.mxu0 %vm3368_vm1, %v3369_v15  ;;  %p3303_p0 = pnand %p3302_p13, %p3296_p10 }
  0xca   :  { %2889 = vmatprep.subr.bf16.mxu0 %v3367_v11  ;;  %2885 = vmatpush3.bf16.msra.mxu1 %v2882_v21 }
  0xcb   :  { %2892 = vmatprep.subr.bf16.mxu1 %v3367_v11 }
  0xcd   :  { %2891 = vmatpush3.bf16.msra.mxu0 %v3635_v14  ;;  %2617 = vmatmul.mubr.msk.f32.vlgmr.msra.gmra.mrb[0].mxu1 %vm197_vm0, %v280_v23 }
  0xce   :  { %2898 = vmatprep.subr.bf16.mxu0 %v3367_v11  ;;  %2894 = vmatpush3.bf16.msra.mxu1 %v3630_v10 }
  0xcf   :  { %2638 = vmatprep.mubr.msk.f32.mxu1 %vm3368_vm1, %v3369_v15  ;;  %2895 = vmatprep.subr.bf16.mxu1 %v3367_v11 }
  0xd0   :  { %2628 = vmatmul.mubr.f32.vlgmr.msra.gmra.mrb[2].mxu0 %v3369_v15 }
  0xd1   :  { %2900 = vmatpush3.bf16.msra.mxu0 %v3630_v10  ;;  %2649 = vmatprep.mubr.msk.f32.mxu0 %vm3368_vm1, %v3369_v15 }
  0xd2   :  { %2901 = vmatprep.subr.bf16.mxu0 %v3367_v11  ;;  %2897 = vmatpush3.bf16.msra.mxu1 %v3635_v14 }
  0xd3   :  { %2904 = vmatprep.subr.bf16.mxu1 %v3367_v11 }
  0xd5   :  { %2903 = vmatpush3.bf16.msra.mxu0 %v3635_v14 }
  0xd6   :  { %2910 = vmatprep.subr.bf16.mxu0 %v3367_v11 }
 0x19b   :  { %v2607_v25 = vpop.f32.mrb[0].mxu0 }
 0x19c   :  { %v3658_v26 = vadd.f32 %v2607_v25, %v2436_v24  ;;  %v270_v27 = vpop.f32.mrb[1].mxu0 }
 0x19d   :  { %v271_v28 = vadd.f32 %v2436_v24, %v270_v27 }
 0x1a0   :  { %v2618_v34 = vpop.f32.mrb[0].mxu1 }
 0x1a1   :  { %v3672_v35 = vadd.f32 %v2618_v34, %v3669_v33  ;;  %v3674_v36 = vpop.f32.mrb[1].mxu1 }
 0x1a2   :  { %v365_v21 = vadd.f32 %v3669_v33, %v3674_v36 }
 0x1a3   :  { %v450_v29 = vpop.f32.mrb[2].mxu0 }
 0x1a4   :  { %v454_v30 = vadd.f32 %v450_v29, %v271_v28  ;;  %v2629_v31 = vpop.f32.mrb[3].mxu0 }
 0x1a6   :  { %3031 = vtanh.f32 %v454_v30 }
 0x1b0   :  { %v3032_v32 = vpop.eup %3031 }
 0x1b1   :  { %457 = vst.msk [vmem:[#allocation2] sm:$0x1] %vm456_vm2, %v3032_v32  ;;  %2639 = vmatmul.mubr.msk.f32.vlgmr.msra.gmra.mrb[2].mxu1 %vm197_vm0, %v3032_v32 }
 0x1b2   :  { %459 = vst.msk [vmem:[#allocation2 + $0x7] sm:$0x2] %vm458_vm3, %v3032_v32  ;;  %2906 = vmatpush3.bf16.msra.mxu1 %v3630_v10  ;;  %2660 = vmatprep.mubr.msk.f32.mxu1 %vm3368_vm1, %v3369_v15 }
 0x1b3   :  { %2907 = vmatprep.subr.bf16.mxu1 %v3367_v11 }
 0x1b6   :  { %2909 = vmatpush3.bf16.msra.mxu1 %v3635_v14 }
 0x1b7   :  { %2916 = vmatprep.subr.bf16.mxu1 %v3367_v11 }
 0x284   :  { %v529_v37 = vpop.f32.mrb[2].mxu1 }
 0x285   :  { %v534_v38 = vrot.slane %v529_v37, 6  ;;  %v2640_v39 = vpop.f32.mrb[3].mxu1 }
 0x287   :  { %v536_v40 = vadd.f32 %v534_v38, %v271_v28 }
 0x289   :  { %3033 = vtanh.f32 %v536_v40 }
 0x293   :  { %v3034_v41 = vpop.eup %3033 }
 0x294   :  { %539 = vst.msk [vmem:[#allocation2 - $0x1] sm:$0x4] %vm538_vm4, %v3034_v41  ;;  %v543_v42 = vrot.slane %v3034_v41, 2 }
 0x295   :  { %541 = vst.msk [vmem:[#allocation2 + $0x6] sm:$0x8] %vm540_vm5, %v3034_v41 }
 0x296   :  { %2650 = vmatmul.mubr.msk.f32.vlgmr.msra.gmra.mrb[4].mxu0 %vm197_vm0, %v543_v42 }
 0x297   :  { %2912 = vmatpush3.bf16.msra.mxu0 %v3630_v10  ;;  %2671 = vmatprep.mubr.msk.f32.mxu0 %vm3368_vm1, %v3369_v15 }
 0x298   :  { %2913 = vmatprep.subr.bf16.mxu0 %v3367_v11 }
 0x29b   :  { %2915 = vmatpush3.bf16.msra.mxu0 %v3635_v14 }
 0x29c   :  { %2922 = vmatprep.subr.bf16.mxu0 %v3367_v11 }
 0x369   :  { %v612_v43 = vpop.f32.mrb[4].mxu0 }
 0x36a   :  { %v617_v44 = vrot.slane %v612_v43, 4  ;;  %v2651_v45 = vpop.f32.mrb[5].mxu0 }
 0x36c   :  { %v619_v46 = vadd.f32 %v617_v44, %v271_v28 }
 0x36e   :  { %3035 = vtanh.f32 %v619_v46 }
 0x378   :  { %v3036_v47 = vpop.eup %3035 }
 0x379   :  { %622 = vst.msk [vmem:[#allocation2 - $0x2] sm:$0x10] %vm621_vm6, %v3036_v47  ;;  %v626_v48 = vrot.slane %v3036_v47, 4 }
 0x37a   :  { %624 = vst.msk [vmem:[#allocation2 + $0x5] sm:$0x20] %vm623_vm7, %v3036_v47 }
 0x37b   :  { %2661 = vmatmul.mubr.msk.f32.vlgmr.msra.gmra.mrb[4].mxu1 %vm197_vm0, %v626_v48 }
 0x37c   :  { %2918 = vmatpush3.bf16.msra.mxu1 %v3630_v10  ;;  %2682 = vmatprep.mubr.msk.f32.mxu1 %vm3368_vm1, %v3369_v15 }
 0x37d   :  { %2919 = vmatprep.subr.bf16.mxu1 %v3367_v11 }
 0x380   :  { %2921 = vmatpush3.bf16.msra.mxu1 %v3635_v14 }
 0x381   :  { %2928 = vmatprep.subr.bf16.mxu1 %v3367_v11 }
 0x44e   :  { %v695_v49 = vpop.f32.mrb[4].mxu1 }
 0x44f   :  { %v700_v50 = vrot.slane %v695_v49, 2  ;;  %v2662_v51 = vpop.f32.mrb[5].mxu1 }
 0x451   :  { %v702_v52 = vadd.f32 %v700_v50, %v271_v28 }
 0x453   :  { %3037 = vtanh.f32 %v702_v52 }
 0x45d   :  { %v3038_v53 = vpop.eup %3037 }
 0x45e   :  { %705 = vst.msk [vmem:[#allocation2 - $0x3] sm:$0x40] %vm704_vm8, %v3038_v53  ;;  %v709_v54 = vrot.slane %v3038_v53, 6 }
 0x45f   :  { %707 = vst.msk [vmem:[#allocation2 + $0x4] sm:$0x80] %vm706_vm9, %v3038_v53 }
 0x460   :  { %2672 = vmatmul.mubr.msk.f32.vlgmr.msra.gmra.mrb[6].mxu0 %vm197_vm0, %v709_v54 }
 0x461   :  { %2924 = vmatpush3.bf16.msra.mxu0 %v3630_v10  ;;  %2693 = vmatprep.mubr.msk.f32.mxu0 %vm3368_vm1, %v3369_v15 }
 0x462   :  { %2925 = vmatprep.subr.bf16.mxu0 %v3367_v11 }
 0x465   :  { %2927 = vmatpush3.bf16.msra.mxu0 %v3635_v14 }
 0x466   :  { %2934 = vmatprep.subr.bf16.mxu0 %v3367_v11 }
 0x533   :  { %v778_v55 = vpop.f32.mrb[6].mxu0 }
 0x534   :  { %v782_v56 = vadd.f32 %v778_v55, %v3658_v26  ;;  %v2673_v57 = vpop.f32.mrb[7].mxu0 }
 0x536   :  { %3039 = vtanh.f32 %v782_v56 }
 0x540   :  { %v3040_v58 = vpop.eup %3039 }
 0x541   :  { %784 = vst.msk [vmem:[#allocation2 + $0x4] sm:$0x1] %vm456_vm2, %v3040_v58  ;;  %2683 = vmatmul.mubr.msk.f32.vlgmr.msra.gmra.mrb[6].mxu1 %vm197_vm0, %v3040_v58 }
 0x542   :  { %785 = vst.msk [vmem:[#allocation2 + $0xb] sm:$0x2] %vm458_vm3, %v3040_v58  ;;  %2930 = vmatpush3.bf16.msra.mxu1 %v3630_v10  ;;  %2704 = vmatprep.mubr.msk.f32.mxu1 %vm3368_vm1, %v3369_v15  ;;  %v379_v10 = vld [vmem:[#allocation15 + $0x10] sm:$0xff] }
 0x543   :  { %2931 = vmatprep.subr.bf16.mxu1 %v3367_v11  ;;  %v3731_v13 = vpack.c.bf16 %v380_v12, %v379_v10  ;;  %v1769_v10 = vld [vmem:[#allocation19 + $0x8] sm:$0xff] }
 0x546   :  { %2933 = vmatpush3.bf16.msra.mxu1 %v3635_v14 }
 0x547   :  { %2940 = vmatprep.subr.bf16.mxu1 %v3367_v11 }
 0x614   :  { %v855_v59 = vpop.f32.mrb[6].mxu1 }
 0x615   :  { %v860_v60 = vrot.slane %v855_v59, 6  ;;  %v2684_v61 = vpop.f32.mrb[7].mxu1 }
 0x617   :  { %v862_v62 = vadd.f32 %v860_v60, %v3658_v26 }
 0x619   :  { %3041 = vtanh.f32 %v862_v62  ;;  %v1672_v62 = vld [vmem:[%s3922_s9] sm:$0xff] }
 0x623   :  { %v3042_v63 = vpop.eup %3041 }
 0x624   :  { %864 = vst.msk [vmem:[#allocation2 + $0x3] sm:$0x4] %vm538_vm4, %v3042_v63  ;;  %v867_v0 = vrot.slane %v3042_v63, 2 }
 0x625   :  { %865 = vst.msk [vmem:[#allocation2 + $0xa] sm:$0x8] %vm540_vm5, %v3042_v63  ;;  %v1673_v63 = vld [vmem:[%s3922_s9 + $0x8] sm:$0xff] }
 0x626   :  { %2694 = vmatmul.mubr.msk.f32.vlgmr.msra.gmra.mrb[8].mxu0 %vm197_vm0, %v867_v0  ;;  %v2982_v0 = vpack.c.bf16 %v1673_v63, %v1672_v62 }
 0x627   :  { %2715 = vmatprep.mubr.msk.f32.mxu0 %vm3368_vm1, %v3369_v15  ;;  %2936 = vmatpush3.bf16.msra.mxu0 %v3725_v9 }
 0x628   :  { %2937 = vmatprep.subr.bf16.mxu0 %v3367_v11 }
 0x62b   :  { %2939 = vmatpush3.bf16.msra.mxu0 %v3731_v13 }
 0x62c   :  { %2946 = vmatprep.subr.bf16.mxu0 %v3367_v11 }
 0x6f9   :  { %v936_v1 = vpop.f32.mrb[8].mxu0 }
 0x6fa   :  { %v941_v2 = vrot.slane %v936_v1, 4  ;;  %v2695_v3 = vpop.f32.mrb[9].mxu0  ;;  %v1674_v1 = vld [vmem:[%s3922_s9 + $0x10] sm:$0xff] }
 0x6fc   :  { %v943_v4 = vadd.f32 %v941_v2, %v3658_v26  ;;  %v1675_v2 = vld [vmem:[%s3922_s9 + $0x18] sm:$0xff] }
 0x6fd   :  { %v2986_v3 = vpack.c.bf16 %v1675_v2, %v1674_v1 }
 0x6fe   :  { %3043 = vtanh.f32 %v943_v4 }
 0x708   :  { %v3044_v5 = vpop.eup %3043 }
 0x709   :  { %945 = vst.msk [vmem:[#allocation2 + $0x2] sm:$0x10] %vm621_vm6, %v3044_v5  ;;  %v948_v6 = vrot.slane %v3044_v5, 4 }
 0x70a   :  { %946 = vst.msk [vmem:[#allocation2 + $0x9] sm:$0x20] %vm623_vm7, %v3044_v5 }
 0x70b   :  { %2705 = vmatmul.mubr.msk.f32.vlgmr.msra.gmra.mrb[8].mxu1 %vm197_vm0, %v948_v6 }
 0x70c   :  { %2726 = vmatprep.mubr.msk.f32.mxu1 %vm3368_vm1, %v3369_v15  ;;  %2942 = vmatpush3.bf16.msra.mxu1 %v3725_v9 }
 0x70d   :  { %2943 = vmatprep.subr.bf16.mxu1 %v3367_v11 }
 0x710   :  { %2945 = vmatpush3.bf16.msra.mxu1 %v3731_v13 }
 0x711   :  { %2952 = vmatprep.subr.bf16.mxu1 %v3367_v11 }
 0x7de   :  { %v1017_v14 = vpop.f32.mrb[8].mxu1 }
 0x7df   :  { %v1022_v16 = vrot.slane %v1017_v14, 2  ;;  %v2706_v17 = vpop.f32.mrb[9].mxu1 }
 0x7e0   :  { %v1771_v17 = vld [vmem:[#allocation19 + $0x18] sm:$0xff] }
 0x7e1   :  { %v1024_v18 = vadd.f32 %v1022_v16, %v3658_v26 }
 0x7e3   :  { %3045 = vtanh.f32 %v1024_v18 }
 0x7ed   :  { %v3046_v19 = vpop.eup %3045 }
 0x7ee   :  { %1026 = vst.msk [vmem:[#allocation2 + $0x1] sm:$0x40] %vm704_vm8, %v3046_v19  ;;  %v1029_v20 = vrot.slane %v3046_v19, 6 }
 0x7ef   :  { %1027 = vst.msk [vmem:[#allocation2 + $0x8] sm:$0x80] %vm706_vm9, %v3046_v19  ;;  %v2457_v19 = vld [vmem:[%s3925_s12] ss:$0 sm:$0xff] }
 0x7f0   :  { %2716 = vmatmul.mubr.msk.f32.vlgmr.msra.gmra.mrb[10].mxu0 %vm197_vm0, %v1029_v20 }
 0x7f1   :  { %2948 = vmatpush3.bf16.msra.mxu0 %v3725_v9  ;;  %2737 = vmatprep.mubr.msk.f32.mxu0 %vm3368_vm1, %v3369_v15 }
 0x7f2   :  { %2949 = vmatprep.subr.bf16.mxu0 %v3367_v11 }
 0x7f5   :  { %2951 = vmatpush3.bf16.msra.mxu0 %v3731_v13  ;;  %v1773_v61 = vld [vmem:[#allocation2] sm:$0xff] }
 0x7f6   :  { %2958 = vmatprep.subr.bf16.mxu0 %v3367_v11  ;;  %v3831_v18 = vld [vmem:[#allocation2 + $0x8] sm:$0xff] }
 0x8c3   :  { %v1098_v22 = vpop.f32.mrb[10].mxu0 }
 0x8c4   :  { %v1102_v23 = vadd.f32 %v1098_v22, %v365_v21  ;;  %v2717_v24 = vpop.f32.mrb[11].mxu0 }
 0x8c6   :  { %3047 = vtanh.f32 %v1102_v23 }
 0x8d0   :  { %v3048_v25 = vpop.eup %3047 }
 0x8d1   :  { %1104 = vst.msk [vmem:[#allocation3] sm:$0x1] %vm456_vm2, %v3048_v25  ;;  %2727 = vmatmul.mubr.msk.f32.vlgmr.msra.gmra.mrb[10].mxu1 %vm197_vm0, %v3048_v25 }
 0x8d2   :  { %1105 = vst.msk [vmem:[#allocation3 + $0x7] sm:$0x2] %vm458_vm3, %v3048_v25  ;;  %2954 = vmatpush3.bf16.msra.mxu1 %v3725_v9  ;;  %2748 = vmatprep.mubr.msk.f32.mxu1 %vm3368_vm1, %v3369_v15 }
 0x8d3   :  { %2955 = vmatprep.subr.bf16.mxu1 %v3367_v11 }
 0x8d6   :  { %2957 = vmatpush3.bf16.msra.mxu1 %v3731_v13 }
 0x8d7   :  { %2964 = vmatprep.subr.bf16.mxu1 %v3367_v11 }
 0x9a4   :  { %v1175_v26 = vpop.f32.mrb[10].mxu1 }
 0x9a5   :  { %v1180_v27 = vrot.slane %v1175_v26, 6  ;;  %v2728_v28 = vpop.f32.mrb[11].mxu1 }
 0x9a7   :  { %v1182_v29 = vadd.f32 %v1180_v27, %v365_v21 }
 0x9a9   :  { %3049 = vtanh.f32 %v1182_v29 }
 0x9b3   :  { %v3050_v30 = vpop.eup %3049 }
 0x9b4   :  { %1184 = vst.msk [vmem:[#allocation3 - $0x1] sm:$0x4] %vm538_vm4, %v3050_v30  ;;  %v1187_v31 = vrot.slane %v3050_v30, 2 }
 0x9b5   :  { %1185 = vst.msk [vmem:[#allocation3 + $0x6] sm:$0x8] %vm540_vm5, %v3050_v30 }
 0x9b6   :  { %2738 = vmatmul.mubr.msk.f32.vlgmr.msra.gmra.mrb[12].mxu0 %vm197_vm0, %v1187_v31 }
 0x9b7   :  { %2960 = vmatpush3.bf16.msra.mxu0 %v3725_v9  ;;  %2759 = vmatprep.mubr.msk.f32.mxu0 %vm3368_vm1, %v3369_v15 }
 0x9b8   :  { %2961 = vmatprep.subr.bf16.mxu0 %v3367_v11 }
 0x9bb   :  { %2963 = vmatpush3.bf16.msra.mxu0 %v3731_v13 }
 0x9bc   :  { %2970 = vmatprep.subr.bf16.mxu0 %v3367_v11 }
 0xa89   :  { %v1256_v32 = vpop.f32.mrb[12].mxu0 }
 0xa8a   :  { %v1261_v33 = vrot.slane %v1256_v32, 4  ;;  %v2739_v34 = vpop.f32.mrb[13].mxu0 }
 0xa8c   :  { %v1263_v36 = vadd.f32 %v1261_v33, %v365_v21 }
 0xa8e   :  { %3051 = vtanh.f32 %v1263_v36 }
 0xa98   :  { %v3052_v37 = vpop.eup %3051 }
 0xa99   :  { %1265 = vst.msk [vmem:[#allocation3 - $0x2] sm:$0x10] %vm621_vm6, %v3052_v37  ;;  %v1268_v38 = vrot.slane %v3052_v37, 4 }
 0xa9a   :  { %1266 = vst.msk [vmem:[#allocation3 + $0x5] sm:$0x20] %vm623_vm7, %v3052_v37 }
 0xa9b   :  { %2749 = vmatmul.mubr.msk.f32.vlgmr.msra.gmra.mrb[12].mxu1 %vm197_vm0, %v1268_v38 }
 0xa9c   :  { %2966 = vmatpush3.bf16.msra.mxu1 %v3725_v9  ;;  %2770 = vmatprep.mubr.msk.f32.mxu1 %vm3368_vm1, %v3369_v15 }
 0xa9d   :  { %2967 = vmatprep.subr.bf16.mxu1 %v3367_v11 }
 0xaa0   :  { %2969 = vmatpush3.bf16.msra.mxu1 %v3731_v13 }
 0xaa1   :  { %2976 = vmatprep.subr.bf16.mxu1 %v3367_v11 }
 0xb6e   :  { %v1337_v39 = vpop.f32.mrb[12].mxu1 }
 0xb6f   :  { %v1342_v40 = vrot.slane %v1337_v39, 2  ;;  %v2750_v41 = vpop.f32.mrb[13].mxu1 }
 0xb71   :  { %v1344_v42 = vadd.f32 %v1342_v40, %v365_v21 }
 0xb73   :  { %3053 = vtanh.f32 %v1344_v42 }
 0xb7d   :  { %v3054_v43 = vpop.eup %3053 }
 0xb7e   :  { %1346 = vst.msk [vmem:[#allocation3 - $0x3] sm:$0x40] %vm704_vm8, %v3054_v43  ;;  %v1349_v44 = vrot.slane %v3054_v43, 6 }
 0xb7f   :  { %1347 = vst.msk [vmem:[#allocation3 + $0x4] sm:$0x80] %vm706_vm9, %v3054_v43 }
 0xb80   :  { %2760 = vmatmul.mubr.msk.f32.vlgmr.msra.gmra.mrb[14].mxu0 %vm197_vm0, %v1349_v44 }
 0xb81   :  { %2972 = vmatpush3.bf16.msra.mxu0 %v3725_v9  ;;  %2781 = vmatprep.mubr.msk.f32.mxu0 %vm3368_vm1, %v3369_v15 }
 0xb82   :  { %2973 = vmatprep.subr.bf16.mxu0 %v3367_v11 }
 0xb85   :  { %2975 = vmatpush3.bf16.msra.mxu0 %v3731_v13 }
 0xb86   :  { %2983 = vmatprep.subr.bf16.mxu0 %v2982_v0 }
 0xc53   :  { %v1418_v45 = vpop.f32.mrb[14].mxu0 }
 0xc54   :  { %v1422_v46 = vadd.f32 %v1418_v45, %v3672_v35  ;;  %v2761_v47 = vpop.f32.mrb[15].mxu0 }
 0xc55   :  { %v1764_v47 = vld [vmem:[#allocation18] sm:$0xff] }
 0xc56   :  { %3055 = vtanh.f32 %v1422_v46 }
 0xc60   :  { %v3056_v48 = vpop.eup %3055 }
 0xc61   :  { %1424 = vst.msk [vmem:[#allocation3 + $0x4] sm:$0x1] %vm456_vm2, %v3056_v48  ;;  %2771 = vmatmul.mubr.msk.f32.vlgmr.msra.gmra.mrb[14].mxu1 %vm197_vm0, %v3056_v48 }
 0xc62   :  { %1425 = vst.msk [vmem:[#allocation3 + $0xb] sm:$0x2] %vm458_vm3, %v3056_v48  ;;  %2978 = vmatpush3.bf16.msra.mxu1 %v3725_v9  ;;  %2792 = vmatprep.mubr.msk.f32.mxu1 %vm3368_vm1, %v3369_v15  ;;  %v1768_v9 = vld [vmem:[#allocation19] sm:$0xff]  ;;  %v1765_v48 = vld [vmem:[#allocation18 + $0x8] sm:$0xff] }
 0xc63   :  { %2979 = vmatprep.subr.bf16.mxu1 %v3367_v11  ;;  %v2991_v12 = vpack.c.bf16 %v1769_v10, %v1768_v9 }
 0xc66   :  { %2981 = vmatpush3.bf16.msra.mxu1 %v3731_v13  ;;  %v1770_v13 = vld [vmem:[#allocation19 + $0x10] sm:$0xff] }
 0xc67   :  { %2806 = vmatprep.subr.mxu1 %v3369_v15 }
 0xd34   :  { %v1495_v49 = vpop.f32.mrb[14].mxu1 }
 0xd35   :  { %v1500_v50 = vrot.slane %v1495_v49, 6  ;;  %v2772_v51 = vpop.f32.mrb[15].mxu1 }
 0xd37   :  { %v1502_v52 = vadd.f32 %v1500_v50, %v3672_v35 }
 0xd39   :  { %3057 = vtanh.f32 %v1502_v52  ;;  %v2997_v52 = vpack.c.bf16 %v1765_v48, %v1764_v47 }
 0xd43   :  { %v3058_v53 = vpop.eup %3057 }
 0xd44   :  { %1504 = vst.msk [vmem:[#allocation3 + $0x3] sm:$0x4] %vm538_vm4, %v3058_v53  ;;  %v1507_v54 = vrot.slane %v3058_v53, 2 }
 0xd45   :  { %1505 = vst.msk [vmem:[#allocation3 + $0xa] sm:$0x8] %vm540_vm5, %v3058_v53 }
 0xd46   :  { %2782 = vmatmul.mubr.msk.f32.vlgmr.msra.gmra.mrb[16].mxu0 %vm197_vm0, %v1507_v54  ;;  %v1766_v54 = vld [vmem:[#allocation18 + $0x10] sm:$0xff] }
 0xd47   :  { %2985 = vmatpush3.bf16.msra.mxu0 %v2982_v0 }
 0xd48   :  { %2987 = vmatprep.subr.bf16.mxu0 %v2986_v3 }
 0xd4b   :  { %2989 = vmatpush3.bf16.msra.mxu0 %v2986_v3 }
 0xd4c   :  { %2990 = vmatprep.subr.bf16.mxu0 %v3367_v11 }
 0xe19   :  { %v1576_v55 = vpop.f32.mrb[16].mxu0 }
 0xe1a   :  { %v1581_v56 = vrot.slane %v1576_v55, 4  ;;  %v2783_v57 = vpop.f32.mrb[17].mxu0  ;;  %v1767_v55 = vld [vmem:[#allocation18 + $0x18] sm:$0xff] }
 0xe1c   :  { %v1583_v58 = vadd.f32 %v1581_v56, %v3672_v35  ;;  %v3000_v56 = vpack.c.bf16 %v1767_v55, %v1766_v54 }
 0xe1e   :  { %3059 = vtanh.f32 %v1583_v58 }
 0xe28   :  { %v3060_v59 = vpop.eup %3059 }
 0xe29   :  { %1585 = vst.msk [vmem:[#allocation3 + $0x2] sm:$0x10] %vm621_vm6, %v3060_v59  ;;  %v1588_v60 = vrot.slane %v3060_v59, 4 }
 0xe2a   :  { %1586 = vst.msk [vmem:[#allocation3 + $0x9] sm:$0x20] %vm623_vm7, %v3060_v59  ;;  %v2465_v59 = vld [vmem:[%s3926_s13] ss:$0 sm:$0xff] }
 0xe2b   :  { %2793 = vmatmul.mubr.msk.f32.vlgmr.msra.gmra.mrb[16].mxu1 %vm197_vm0, %v1588_v60 }
 0xe2c   :  { %2807 = vmatpush3.xpose.msk.msra.mxu1 %vm197_vm0, %v1773_v61  ;;  %2808 = vmatprep.mubr.msk.f32.mxu1 %vm3368_vm1, %v3369_v15 }
 0xe2d   :  { %2811 = vmatprep.subr.mxu1 %v3369_v15 }
 0xefe   :  { %v1657_v4 = vpop.f32.mrb[16].mxu1 }
 0xeff   :  { %v1662_v5 = vrot.slane %v1657_v4, 2  ;;  %v2794_v6 = vpop.f32.mrb[17].mxu1 }
 0xf01   :  { %v1664_v7 = vadd.f32 %v1662_v5, %v3672_v35  ;;  %v2994_v35 = vpack.c.bf16 %v1771_v17, %v1770_v13 }
 0xf03   :  { %3061 = vtanh.f32 %v1664_v7 }
 0xf0d   :  { %v3062_v8 = vpop.eup %3061 }
 0xf0e   :  { %1666 = vst.msk [vmem:[#allocation3 + $0x1] sm:$0x40] %vm704_vm8, %v3062_v8 }
 0xf0f   :  { %1667 = vst.msk [vmem:[#allocation3 + $0x8] sm:$0x80] %vm706_vm9, %v3062_v8 }
 0xf10   :  { %1669 = vst.msk [vmem:[#allocation22 - $0x6] sm:$0xc0] %vm1668_vm10, %v3062_v8 }
 0xf15   :  { %v1670_v14 = vld [vmem:[#allocation3] sm:$0xff] }
 0xf16   :  { %v1671_v16 = vld [vmem:[#allocation3 + $0x8] sm:$0xff]  ;;  %2803 = vmatprep.mubr.msk.f32.mxu0 %vm197_vm0, %v1670_v14 }
 0xf17   :  { %2804 = vmatmul.mubr.msk.f32.vlgmr.msra.gmra.mrb[18].mxu0 %vm197_vm0, %v1671_v16 }
 0xf18   :  { %2992 = vmatpush3.bf16.msra.mxu0 %v2991_v12  ;;  %2824 = vmatprep.mubr.msk.f32.mxu0 %vm3368_vm1, %v3369_v15 }
 0xf19   :  { %2993 = vmatprep.subr.bf16.mxu0 %v3367_v11 }
 0xf1c   :  { %2995 = vmatpush3.bf16.msra.mxu0 %v2994_v35 }
 0xf1d   :  { %2838 = vmatprep.subr.mxu0 %v3369_v15 }
 0xf1f   :  { %2825 = vmatmul.mubr.msk.f32.vlgmr.msra.gmra.mrb[20].mxu0 %vm197_vm0, %v1670_v14 }
 0xf20   :  { %2840 = vmatprep.mubr.msk.f32.mxu0 %vm3368_vm1, %v3369_v15 }
 0xf25   :  { %2839 = vmatpush3.xpose.msk.msra.mxu0 %vm197_vm0, %v3831_v18 }
 0xf26   :  { %3002 = vmatprep.subr.bf16.mxu0 %v3367_v11 }
 0xfea   :  { %v2805_v20 = vpop.f32.mrb[18].mxu0 }
 0xfeb   :  { %v1761_v21 = vadd.f32 %v2805_v20, %v2457_v19  ;;  %v1755_v22 = vpop.f32.mrb[19].mxu0 }
 0xfec   :  { %v1756_v23 = vadd.f32 %v2457_v19, %v1755_v22 }
 0xfed   :  { %2841 = vmatmul.mubr.msk.f32.vlgmr.msra.gmra.mrb[22].mxu0 %vm197_vm0, %v1761_v21 }
 0xfee   :  { %3004 = vmatpush3.bf16.msra.mxu0 %v2991_v12  ;;  %2809 = vmatmul.mubr.msk.f32.vlgmr.msra.gmra.mrb[18].mxu1 %vm197_vm0, %v1756_v23 }
 0xfef   :  { %2812 = vmatpush3.msra.mxu1 %v1773_v61  ;;  %3005 = vmatprep.subr.bf16.mxu0 %v3367_v11 }
 0xff0   :  { %2856 = vmatprep.mubr.msk.f32.mxu0 %vm3368_vm1, %v3369_v15  ;;  %2813 = vmatprep.mubr.msk.f32.mxu1 %vm3368_vm1, %v3369_v15 }
 0xff1   :  { %2996 = vmatprep.subr.bf16.mxu1 %v3367_v11 }
 0xff2   :  { %v3847_v24 = vpop.f32.mrb[20].mxu0  ;;  %3007 = vmatpush3.bf16.msra.mxu0 %v2994_v35 }
 0xff3   :  { %v2826_v25 = vpop.f32.mrb[21].mxu0 }
 0xff5   :  { %2857 = vmatmul.mubr.msk.f32.vlgmr.msra.gmra.mrb[24].mxu0 %vm197_vm0, %v1671_v16 }
0x10c0   :  { %v2161_v26 = vpop.f32.mrb[22].mxu0 }
0x10c1   :  { %v1846_v27 = vpop.f32.mrb[18].mxu1  ;;  %v2842_v28 = vpop.f32.mrb[23].mxu0  ;;  %v2165_v29 = vsel %vm1850_vm11, %v2161_v26, -inf }
0x10c2   :  { %2166 = vmax.xlane.f32.xlu1 %v2165_v29  ;;  %v2810_v30 = vpop.f32.mrb[19].mxu1  ;;  %v1851_v31 = vsel %vm1850_vm11, %v1846_v27, -inf }
0x10c3   :  { %1852 = vmax.xlane.f32.xlu0 %v1851_v31 }
0x10c8   :  { %v3852_v32 = vpop.f32.mrb[24].mxu0 }
0x10c9   :  { %v2858_v33 = vpop.f32.mrb[25].mxu0 }
0x114f   :  { %v2167_v34 = vpop.xlane.xlu1 %2166 }
0x1150   :  { %v2168_v36 = vsub.f32 %v2161_v26, %v2167_v34  ;;  %v1853_v37 = vpop.xlane.xlu0 %1852 }
0x1151   :  { %v1854_v38 = vsub.f32 %v1846_v27, %v1853_v37 }
0x1152   :  { %v2169_v39 = vmul.f32 1.442695, %v2168_v36 }
0x1153   :  { %v1855_v40 = vmul.f32 1.442695, %v1854_v38 }
0x1154   :  { %3063 = vpow2.f32 %v2169_v39 }
0x1155   :  { %3065 = vpow2.f32 %v1855_v40 }
0x115e   :  { %v3064_v41 = vpop.eup %3063 }
0x115f   :  { %v3066_v42 = vpop.eup %3065  ;;  %v2171_v43 = vsel %vm1850_vm11, %v3064_v41, 0.0 }
0x1160   :  { %2172 = vadd.xlane.f32.xlu1 %v2171_v43  ;;  %v1857_v44 = vsel %vm1850_vm11, %v3066_v42, 0.0 }
0x1161   :  { %1858 = vadd.xlane.f32.xlu0 %v1857_v44 }
0x11ed   :  { %v2173_v45 = vpop.xlane.xlu1 %2172 }
0x11ee   :  { %3067 = vrcp.f32 %v2173_v45  ;;  %v1859_v46 = vpop.xlane.xlu0 %1858 }
0x11ef   :  { %3069 = vrcp.f32 %v1859_v46 }
0x11f8   :  { %v3068_v49 = vpop.eup %3067 }
0x11f9   :  { %v3070_v50 = vpop.eup %3069  ;;  %v2175_v51 = vmul.f32 %v3068_v49, %v3064_v41 }
0x11fa   :  { %v1861_v53 = vmul.f32 %v3070_v50, %v3066_v42 }
0x11fb   :  { %2395 = vst.msk [vmem:[%s3928_s15 + $0x8] sm:$0xff] %vm1850_vm11, %v2175_v51 }
0x11fc   :  { %2087 = vst.msk [vmem:[%s3928_s15] sm:$0xff] %vm1850_vm11, %v1861_v53  ;;  %2814 = vmatmul.mubr.msk.f32.vlgmr.msra.gmra.mrb[20].mxu1 %vm1850_vm11, %v1861_v53 }
0x11fd   :  { %2998 = vmatpush3.bf16.msra.mxu1 %v2997_v52  ;;  %2835 = vmatprep.mubr.msk.f32.mxu1 %vm3368_vm1, %v3369_v15 }
0x11fe   :  { %2999 = vmatprep.subr.bf16.mxu1 %v3367_v11 }
0x1201   :  { %3001 = vmatpush3.bf16.msra.mxu1 %v3000_v56 }
0x1202   :  { %2843 = vmatprep.subr.mxu1 %v3369_v15 }
0x12cf   :  { %v1931_v57 = vpop.f32.mrb[20].mxu1 }
0x12d0   :  { %v2815_v58 = vpop.f32.mrb[21].mxu1  ;;  %2836 = vmatmul.mubr.msk.f32.vlgmr.msra.gmra.mrb[22].mxu1 %vm197_vm0, %v1931_v57 }
0x12d1   :  { %2844 = vmatpush3.msra.mxu1 %v3831_v18  ;;  %2845 = vmatprep.mubr.msk.f32.mxu1 %vm3368_vm1, %v3369_v15 }
0x12d2   :  { %3008 = vmatprep.subr.bf16.mxu1 %v3367_v11 }
0x12d4   :  { %2846 = vmatmul.mubr.msk.f32.vlgmr.msra.gmra.mrb[24].mxu1 %vm1850_vm11, %v2175_v51 }
0x12d5   :  { %3010 = vmatpush3.bf16.msra.mxu1 %v2997_v52  ;;  %2867 = vmatprep.mubr.msk.f32.mxu1 %vm3368_vm1, %v3369_v15 }
0x12d6   :  { %3011 = vmatprep.subr.bf16.mxu1 %v3367_v11 }
0x12d9   :  { %3013 = vmatpush3.bf16.msra.mxu1 %v3000_v56 }
0x13a3   :  { %v2074_v60 = vpop.f32.mrb[22].mxu1 }
0x13a4   :  { %v2075_v61 = vadd.f32 %v2074_v60, %v3847_v24  ;;  %v2837_v62 = vpop.f32.mrb[23].mxu1 }
0x13a6   :  { %v2084_v63 = vadd.f32 %v2465_v59, %v2075_v61 }
0x13a7   :  { %v2245_v0 = vpop.f32.mrb[24].mxu1 }
0x13a8   :  { %3071 = vtanh.f32 %v2084_v63  ;;  %v2847_v1 = vpop.f32.mrb[25].mxu1  ;;  %2868 = vmatmul.mubr.msk.f32.vlgmr.msra.gmra.mrb[26].mxu1 %vm197_vm0, %v2245_v0 }
0x13b2   :  { %v3072_v2 = vpop.eup %3071 }
0x13b3   :  { %2086 = vst.msk [vmem:[#allocation21] sm:$0xff] %vm197_vm0, %v3072_v2 }
0x13b4   :  { %3306 = shalt.err (!%p3303_p0)
}
0x13b5   :  { %s3307_s19 = scalar_lea.hbm %s3929_s16, 32 }
0x13b6   :  { %p3308_p1 = scmp.ne.s32.totalorder %s3929_s16, %s3307_s19  ;;  %p3311_p2 = scmp.lt.u32.totalorder %s3307_s19, %s3929_s16 }
0x13b8   :  { %p3313_p3 = pnand %p3311_p2, %p3308_p1 }
0x13ba   :  { %3316 = shalt.err (!%p3313_p3)
}
0x13bb   :  { %2419 = dma.vmem_to_hbm [thread:$0]  %s2417_s18, 32, %s3929_s16, [#allocation23]  }
0x13bc   :  { %s3371_s6 = smov [#allocation21]  }
0x13bd   :  { %s2401_s0 = sshll.u32 %s3371_s6, 4  ;;  %s2402_s0 = int_to_ptr.vmem [resolvable:$true] %s2401_s0 }
0x13be   :  { %s3317_s26 = scalar_lea.vmem %s2402_s0, 256  ;;  %p3322_p5 = scmp.lt.s32.totalorder %s2402_s0, %s2402_s0 }
0x13bf   :  { %p3318_p4 = scmp.ne.s32.totalorder %s2402_s0, %s3317_s26  ;;  %p3323_p6 = scmp.lt.s32.totalorder %s3317_s26, %s3317_s26 }
0x13c1   :  { %p3324_p7 = por %p3323_p6, %p3322_p5 }
0x13c3   :  { %p3325_p8 = pnand %p3324_p7, %p3318_p4 }
0x147b   :  { %v2388_v11 = vpop.f32.mrb[26].mxu1 }
0x147c   :  { %v2389_v15 = vadd.f32 %v2388_v11, %v3852_v32  ;;  %v2869_v3 = vpop.f32.mrb[27].mxu1 }
0x147e   :  { %v2392_v4 = vadd.f32 %v2465_v59, %v2389_v15 }
0x1480   :  { %3073 = vtanh.f32 %v2392_v4 }
0x148a   :  { %v3074_v5 = vpop.eup %3073 }
0x148b   :  { %2394 = vst.msk [vmem:[#allocation21 + $0x8] sm:$0xff] %vm197_vm0, %v3074_v5 }
0x148c   :  { %3328 = shalt.err (!%p3325_p8)
}
0x148d   :  { %s3329_s22 = scalar_lea.hbm %s3927_s14, 256 }
0x148e   :  { %p3330_p9 = scmp.ne.s32.totalorder %s3927_s14, %s3329_s22  ;;  %p3333_p10 = scmp.lt.u32.totalorder %s3329_s22, %s3927_s14 }
0x1490   :  { %p3335_p11 = pnand %p3333_p10, %p3330_p9 }
0x1492   :  { %3338 = shalt.err (!%p3335_p11)
}
0x1493   :  { %2407 = dma.vmem_to_hbm [thread:$0]  %s2402_s0, 256, %s3927_s14, [#allocation6], %s3357_s30, %s3357_s30, %s3358_s17  }
0x1494   :  { %3351 = dma.done.wait [#allocation6], 256  }
0x1495   :  { %3352 = vsyncadd [#allocation6], 4294967040 }
0x1496   :  { %3353 = dma.done.wait [#allocation23], 32  }
0x1497   :  { %3354 = vsyncadd [#allocation23], 4294967264 }
0x1498   :  { %2428 = vsyncpa [#allocation5], 1 }
0x1499   :  { %2429 = vsyncpa [#allocation8], 1 }
0x149a   :  { %2430 = vsyncpa [#allocation11], 1 }
0x149b   :  { %2431 = vsyncpa [#allocation14], 1 }
0x149c   :  { %2432 = vsyncpa [#allocation17], 1 }
0x149d   :  { %2433 = vsyncpa [#allocation20], 1 }
0x149e   :  { %2434 = vsyncpa [#allocation6], 1 }
0x149f   :  { %2435 = vsyncpa [#allocation23], 1 }

</bundles_post_ra>
